<compile_context>
chip_gen: v5e
topology: v5e:2x2
jax: 0.10.0
libtpu: 0.0.40
codegen_flags: <defaults>
</compile_context>

<pallas_src>
import math

import jax
import jax.numpy as jnp
from jax.experimental import pallas as pl
from jax.experimental.pallas import tpu as pltpu

# ----------------------- scaled-down ViT hyper-parameters ---------------------
IN_CHANNELS = 3          # Transformer(in_channels=3) default
N_OUTPUTS   = 1          # Transformer(noutputs=1) default
IMAGE_SIZE  = 32
PATCH_SIZE  = 16
HIDDEN_DIM  = 128
NUM_LAYERS  = 2
NUM_HEADS   = 4
MLP_DIM     = 256
LN_EPS      = 1e-6

NUM_PATCHES = (IMAGE_SIZE // PATCH_SIZE) ** 2    # 4
SEQ_LEN     = NUM_PATCHES + 1                    # 5
HEAD_DIM    = HIDDEN_DIM // NUM_HEADS            # 32


# ------------------------------ in-kernel helpers -----------------------------
def _layernorm(v, w, b):
    mu = jnp.mean(v, axis=-1, keepdims=True)
    var = jnp.mean(jnp.square(v - mu), axis=-1, keepdims=True)
    return (v - mu) * jax.lax.rsqrt(var + LN_EPS) * w + b


def _gelu_tanh(x):
    # tanh-form GELU: the transcendental lands on the EUP slot instead of a
    # ~12-op VALU erf polynomial; |gelu_tanh - gelu_erf| << 1e-3 at these
    # activation magnitudes, well inside the check tolerance.
    c = math.sqrt(2.0 / math.pi)
    return 0.5 * x * (1.0 + jnp.tanh(c * (x + 0.044715 * x * x * x)))


# ------------------------------- fused ViT kernel ------------------------------
def _make_vit_kernel(batch):
    B = batch
    S = SEQ_LEN
    N = NUM_PATCHES
    D = HIDDEN_DIM

    def kernel(patches_ref, convw_ref, convb_ref, clspos_ref, posrest_ref,
               ln1w, ln1b, qkvw, qkvb, ow, ob,
               ln2w, ln2b, f1w, f1b, f2w, f2b,
               lnw, lnb, hw, hb,
               out_ref, seq_ref):
        layer = pl.program_id(0)

        # ---- step 0: patch embedding + cls token + positional embedding ----
        @pl.when(layer == 0)
        def _():
            tok = jnp.dot(patches_ref[...], convw_ref[...],
                          preferred_element_type=jnp.float32) + convb_ref[...]
            cls_row = clspos_ref[...]      # (1, D) = class_token + pos[0]
            pos_r = posrest_ref[...]       # (N, D) = pos[1:]
            rows = []
            for b in range(B):             # static unroll over batch
                rows.append(cls_row)
                rows.append(tok[b * N:(b + 1) * N, :] + pos_r)
            seq_ref[...] = jnp.concatenate(rows, axis=0)        # (B*S, D)

        # ---- encoder layer `layer` on the VMEM-resident sequence ----
        x = seq_ref[...]                                        # (B*S, D) f32
        h = _layernorm(x, ln1w[0], ln1b[0])
        qkv = (jnp.dot(h.astype(jnp.bfloat16), qkvw[0],
                       preferred_element_type=jnp.float32) + qkvb[0])
        q = qkv[:, 0 * D:1 * D]
        k = qkv[:, 1 * D:2 * D]
        v = qkv[:, 2 * D:3 * D]
        scale = 1.0 / math.sqrt(HEAD_DIM)

        ctx_rows = []
        for b in range(B):                                      # static unroll
            r0 = b * S
            qb, kb, vb = q[r0:r0 + S], k[r0:r0 + S], v[r0:r0 + S]
            heads = []
            for hd in range(NUM_HEADS):                         # static unroll
                lo, hi = hd * HEAD_DIM, (hd + 1) * HEAD_DIM
                s = jnp.dot(qb[:, lo:hi], kb[:, lo:hi].T,
                            preferred_element_type=jnp.float32) * scale
                s = s - jnp.max(s, axis=-1, keepdims=True)
                e = jnp.exp(s)
                p = e * pl.reciprocal(jnp.sum(e, axis=-1, keepdims=True),
                                      approx=True)
                heads.append(jnp.dot(p, vb[:, lo:hi],
                                     preferred_element_type=jnp.float32))
            ctx_rows.append(jnp.concatenate(heads, axis=-1))    # (S, D)
        ctx = jnp.concatenate(ctx_rows, axis=0)                 # (B*S, D)

        # single fused K=D output projection (replaces 4 K=32 matmuls)
        attn = (jnp.dot(ctx.astype(jnp.bfloat16), ow[0],
                        preferred_element_type=jnp.float32) + ob[0])
        y = x + attn

        h2 = _layernorm(y, ln2w[0], ln2b[0])
        f1 = (jnp.dot(h2.astype(jnp.bfloat16), f1w[0],
                      preferred_element_type=jnp.float32) + f1b[0])
        g = _gelu_tanh(f1)
        f2 = (jnp.dot(g.astype(jnp.bfloat16), f2w[0],
                      preferred_element_type=jnp.float32) + f2b[0])
        new_seq = y + f2
        seq_ref[...] = new_seq

        # ---- last step: final LayerNorm on the cls tokens only + head ----
        @pl.when(layer == NUM_LAYERS - 1)
        def _():
            cls = jnp.concatenate(
                [new_seq[b * S:b * S + 1, :] for b in range(B)], axis=0)  # (B,D)
            cls = _layernorm(cls, lnw[...], lnb[...])
            out_ref[...] = (jnp.dot(cls, hw[...],
                                    preferred_element_type=jnp.float32)
                            + hb[...])

    return kernel


# ------------------------------ pallas_call wrapper ----------------------------
@jax.jit
def transformer_forward(x, params):
    B, C, H, W = x.shape
    nH, nW = H // PATCH_SIZE, W // PATCH_SIZE
    NP = nH * nW
    D = HIDDEN_DIM
    CK = C * PATCH_SIZE * PATCH_SIZE
    bf = jnp.bfloat16

    # im2col (glue): Conv2d(kernel=P, stride=P) == per-patch linear projection
    patches = x.reshape(B, C, nH, PATCH_SIZE, nW, PATCH_SIZE)
    patches = patches.transpose(0, 2, 4, 1, 3, 5).reshape(B * NP, CK)

    conv_w = params["conv_w"].reshape(D, CK).T                  # (CK, D)
    conv_b = params["conv_b"].reshape(1, D)
    cls_pos0 = (params["class_token"].reshape(1, D)
                + params["pos_embedding"][0, 0:1, :])           # (1, D)
    pos_rest = params["pos_embedding"][0, 1:, :]                # (NP, D)

    layers = params["layers"]

    def stack(fn, dtype=jnp.float32):
        return jnp.stack([fn(lp) for lp in layers]).astype(dtype)

    ln1w_s = stack(lambda lp: lp["ln1_w"].reshape(1, D))
    ln1b_s = stack(lambda lp: lp["ln1_b"].reshape(1, D))
    qkvw_s = stack(lambda lp: lp["in_proj_w"].T, bf)            # (L, D, 3D)
    qkvb_s = stack(lambda lp: lp["in_proj_b"].reshape(1, 3 * D))
    outw_s = stack(lambda lp: lp["out_proj_w"].T, bf)           # (L, D, D)
    outb_s = stack(lambda lp: lp["out_proj_b"].reshape(1, D))
    ln2w_s = stack(lambda lp: lp["ln2_w"].reshape(1, D))
    ln2b_s = stack(lambda lp: lp["ln2_b"].reshape(1, D))
    f1w_s = stack(lambda lp: lp["fc1_w"].T, bf)                 # (L, D, MLP)
    f1b_s = stack(lambda lp: lp["fc1_b"].reshape(1, MLP_DIM))
    f2w_s = stack(lambda lp: lp["fc2_w"].T, bf)                 # (L, MLP, D)
    f2b_s = stack(lambda lp: lp["fc2_b"].reshape(1, D))

    ln_w = params["ln_w"].reshape(1, D)
    ln_b = params["ln_b"].reshape(1, D)
    head_w = params["head_w"].T                                 # (D, n_out)
    head_b = params["head_b"].reshape(1, N_OUTPUTS)

    def const(shape):
        nd = len(shape)
        return pl.BlockSpec(shape, lambda l, _nd=nd: (0,) * _nd)

    def per_layer(r, c):
        return pl.BlockSpec((1, r, c), lambda l: (l, 0, 0))

    in_specs = [
        const((B * NP, CK)),                              # patches
        const((CK, D)),                                   # conv_w
        const((1, D)),                                    # conv_b
        const((1, D)),                                    # cls + pos[0]
        const((NP, D)),                                   # pos[1:]
        per_layer(1, D), per_layer(1, D),                 # ln1 w/b
        per_layer(D, 3 * D), per_layer(1, 3 * D),         # qkv w/b
        per_layer(D, D), per_layer(1, D),                 # out-proj w/b
        per_layer(1, D), per_layer(1, D),                 # ln2 w/b
        per_layer(D, MLP_DIM), per_layer(1, MLP_DIM),     # fc1 w/b
        per_layer(MLP_DIM, D), per_layer(1, D),           # fc2 w/b
        const((1, D)), const((1, D)),                     # final ln w/b
        const((D, N_OUTPUTS)), const((1, N_OUTPUTS)),     # head w/b
    ]

    return pl.pallas_call(
        _make_vit_kernel(B),
        out_shape=jax.ShapeDtypeStruct((B, N_OUTPUTS), jnp.float32),
        grid=(NUM_LAYERS,),
        in_specs=in_specs,
        out_specs=pl.BlockSpec((B, N_OUTPUTS), lambda l: (0, 0)),
        scratch_shapes=[pltpu.VMEM((B * SEQ_LEN, D), jnp.float32)],
        compiler_params=pltpu.CompilerParams(
            # the layer axis carries `seq` state in VMEM scratch -> sequential
            dimension_semantics=("arbitrary",)),
    )(patches, conv_w, conv_b, cls_pos0, pos_rest,
      ln1w_s, ln1b_s, qkvw_s, qkvb_s, outw_s, outb_s,
      ln2w_s, ln2b_s, f1w_s, f1b_s, f2w_s, f2b_s,
      ln_w, ln_b, head_w, head_b)


# --------------------------------- parameters ----------------------------------
def init_params(key):
    ks = jax.random.split(key, 8 + NUM_LAYERS)

    def nrm(k, shape, scale=0.02):
        return scale * jax.random.normal(k, shape, dtype=jnp.float32)

    params = {
        # conv_proj = Conv2d(in_channels, D, kernel=(16,16), stride=(16,16))
        "conv_w": nrm(ks[0], (HIDDEN_DIM, IN_CHANNELS, PATCH_SIZE, PATCH_SIZE)),
        "conv_b": nrm(ks[1], (HIDDEN_DIM,)),
        "class_token": nrm(ks[2], (1, 1, HIDDEN_DIM)),
        "pos_embedding": nrm(ks[3], (1, SEQ_LEN, HIDDEN_DIM)),
        "ln_w": jnp.ones((HIDDEN_DIM,), jnp.float32),
        "ln_b": jnp.zeros((HIDDEN_DIM,), jnp.float32),
        # heads.head = Linear(D, n_outputs, bias=True)
        "head_w": nrm(ks[4], (N_OUTPUTS, HIDDEN_DIM)),
        "head_b": nrm(ks[5], (N_OUTPUTS,)),
        "layers": [],
    }
    for i in range(NUM_LAYERS):
        lk = jax.random.split(ks[8 + i], 8)
        params["layers"].append(dict(
            ln1_w=jnp.ones((HIDDEN_DIM,), jnp.float32),
            ln1_b=jnp.zeros((HIDDEN_DIM,), jnp.float32),
            in_proj_w=nrm(lk[0], (3 * HIDDEN_DIM, HIDDEN_DIM)),
            in_proj_b=nrm(lk[1], (3 * HIDDEN_DIM,)),
            out_proj_w=nrm(lk[2], (HIDDEN_DIM, HIDDEN_DIM)),
            out_proj_b=nrm(lk[3], (HIDDEN_DIM,)),
            ln2_w=jnp.ones((HIDDEN_DIM,), jnp.float32),
            ln2_b=jnp.zeros((HIDDEN_DIM,), jnp.float32),
            fc1_w=nrm(lk[4], (MLP_DIM, HIDDEN_DIM)),
            fc1_b=nrm(lk[5], (MLP_DIM,)),
            fc2_w=nrm(lk[6], (HIDDEN_DIM, MLP_DIM)),
            fc2_b=nrm(lk[7], (HIDDEN_DIM,)),
        ))
    return params


# ------------------------------ pure-JAX reference -------------------------------
def transformer_reference(x, params):
    B, C, H, W = x.shape
    nH, nW = H // PATCH_SIZE, W // PATCH_SIZE
    patches = x.reshape(B, C, nH, PATCH_SIZE, nW, PATCH_SIZE)
    patches = patches.transpose(0, 2, 4, 1, 3, 5).reshape(B * nH * nW, -1)
    tok = (patches @ params["conv_w"].reshape(HIDDEN_DIM, -1).T
           + params["conv_b"]).reshape(B, nH * nW, HIDDEN_DIM)
    cls = jnp.broadcast_to(params["class_token"], (B, 1, HIDDEN_DIM))
    seq = jnp.concatenate([cls, tok], axis=1) + params["pos_embedding"]

    def ln(v, w_, b_):
        mu = v.mean(-1, keepdims=True)
        var = ((v - mu) ** 2).mean(-1, keepdims=True)
        return (v - mu) / jnp.sqrt(var + LN_EPS) * w_ + b_

    def split_heads(a):
        return a.reshape(B, SEQ_LEN, NUM_HEADS, HEAD_DIM).transpose(0, 2, 1, 3)

    for lp in params["layers"]:
        h = ln(seq, lp["ln1_w"], lp["ln1_b"])
        qkv = h @ lp["in_proj_w"].T + lp["in_proj_b"]
        q, k, v = jnp.split(qkv, 3, axis=-1)
        qh, kh, vh = split_heads(q), split_heads(k), split_heads(v)
        s = jnp.einsum("bhqd,bhkd->bhqk", qh, kh) / math.sqrt(HEAD_DIM)
        p = jax.nn.softmax(s, axis=-1)
        ctx = jnp.einsum("bhqk,bhkd->bhqd", p, vh)
        ctx = ctx.transpose(0, 2, 1, 3).reshape(B, SEQ_LEN, HIDDEN_DIM)
        y = seq + ctx @ lp["out_proj_w"].T + lp["out_proj_b"]
        h2 = ln(y, lp["ln2_w"], lp["ln2_b"])
        f = jax.nn.gelu(h2 @ lp["fc1_w"].T + lp["fc1_b"], approximate=False)
        seq = y + f @ lp["fc2_w"].T + lp["fc2_b"]
    cls_out = ln(seq, params["ln_w"], params["ln_b"])[:, 0, :]
    return cls_out @ params["head_w"].T + params["head_b"]


if __name__ == "__main__":
    key = jax.random.PRNGKey(0)
    pkey, xkey = jax.random.split(key)
    params = init_params(pkey)
    x = jax.random.normal(xkey, (2, IN_CHANNELS, IMAGE_SIZE, IMAGE_SIZE),
                          dtype=jnp.float32)

    out = transformer_forward(x, params)
    out = jax.block_until_ready(out)

    ref = transformer_reference(x, params)
    assert out.shape == (2, N_OUTPUTS)
    assert bool(jnp.all(jnp.isfinite(out)))
    # Kernel runs the encoder matmuls in bf16 (f32 accumulation / stats), so the
    # tolerance vs. the full-f32 reference is loosened slightly vs. pure f32.
    max_err = float(jnp.max(jnp.abs(out - ref)))
    assert max_err < 1e-2, max_err
    print("KERNEL_OK")
</pallas_src>

<mosaic_0001>
module attributes {stable_mosaic.version = 11 : i64} {
  func.func @kernel(%arg0: i32, %arg1: memref<8x768xf32, #tpu.memory_space<vmem>>, %arg2: memref<768x128xf32, #tpu.memory_space<vmem>>, %arg3: memref<1x128xf32, #tpu.memory_space<vmem>>, %arg4: memref<1x128xf32, #tpu.memory_space<vmem>>, %arg5: memref<4x128xf32, #tpu.memory_space<vmem>>, %arg6: memref<1x1x128xf32, #tpu.memory_space<vmem>>, %arg7: memref<1x1x128xf32, #tpu.memory_space<vmem>>, %arg8: memref<1x128x384xbf16, #tpu.memory_space<vmem>>, %arg9: memref<1x1x384xf32, #tpu.memory_space<vmem>>, %arg10: memref<1x128x128xbf16, #tpu.memory_space<vmem>>, %arg11: memref<1x1x128xf32, #tpu.memory_space<vmem>>, %arg12: memref<1x1x128xf32, #tpu.memory_space<vmem>>, %arg13: memref<1x1x128xf32, #tpu.memory_space<vmem>>, %arg14: memref<1x128x256xbf16, #tpu.memory_space<vmem>>, %arg15: memref<1x1x256xf32, #tpu.memory_space<vmem>>, %arg16: memref<1x256x128xbf16, #tpu.memory_space<vmem>>, %arg17: memref<1x1x128xf32, #tpu.memory_space<vmem>>, %arg18: memref<1x128xf32, #tpu.memory_space<vmem>>, %arg19: memref<1x128xf32, #tpu.memory_space<vmem>>, %arg20: memref<128x1xf32, #tpu.memory_space<vmem>>, %arg21: memref<1x1xf32, #tpu.memory_space<vmem>>, %arg22: memref<2x1xf32, #tpu.memory_space<vmem>>, %arg23: memref<10x128xf32, #tpu.memory_space<vmem>>) attributes {dimension_semantics = [#tpu.dimension_semantics<arbitrary>], iteration_bounds = array<i64: 2>, scalar_prefetch = 0 : i64, scratch_operands = 1 : i64, tpu.core_type = #tpu.core_type<tc>, window_params = [{pipeline_mode = #tpu.pipeline_mode<synchronous>, transform_indices = @transform_0, window_bounds = array<i64: 8, 768>}, {pipeline_mode = #tpu.pipeline_mode<synchronous>, transform_indices = @transform_1, window_bounds = array<i64: 768, 128>}, {pipeline_mode = #tpu.pipeline_mode<synchronous>, transform_indices = @transform_2, window_bounds = array<i64: 1, 128>}, {pipeline_mode = #tpu.pipeline_mode<synchronous>, transform_indices = @transform_3, window_bounds = array<i64: 1, 128>}, {pipeline_mode = #tpu.pipeline_mode<synchronous>, transform_indices = @transform_4, window_bounds = array<i64: 4, 128>}, {transform_indices = @transform_5, window_bounds = array<i64: 1, 1, 128>}, {transform_indices = @transform_6, window_bounds = array<i64: 1, 1, 128>}, {transform_indices = @transform_7, window_bounds = array<i64: 1, 128, 384>}, {transform_indices = @transform_8, window_bounds = array<i64: 1, 1, 384>}, {transform_indices = @transform_9, window_bounds = array<i64: 1, 128, 128>}, {transform_indices = @transform_10, window_bounds = array<i64: 1, 1, 128>}, {transform_indices = @transform_11, window_bounds = array<i64: 1, 1, 128>}, {transform_indices = @transform_12, window_bounds = array<i64: 1, 1, 128>}, {transform_indices = @transform_13, window_bounds = array<i64: 1, 128, 256>}, {transform_indices = @transform_14, window_bounds = array<i64: 1, 1, 256>}, {transform_indices = @transform_15, window_bounds = array<i64: 1, 256, 128>}, {transform_indices = @transform_16, window_bounds = array<i64: 1, 1, 128>}, {pipeline_mode = #tpu.pipeline_mode<synchronous>, transform_indices = @transform_17, window_bounds = array<i64: 1, 128>}, {pipeline_mode = #tpu.pipeline_mode<synchronous>, transform_indices = @transform_18, window_bounds = array<i64: 1, 128>}, {pipeline_mode = #tpu.pipeline_mode<synchronous>, transform_indices = @transform_19, window_bounds = array<i64: 128, 1>}, {pipeline_mode = #tpu.pipeline_mode<synchronous>, transform_indices = @transform_20, window_bounds = array<i64: 1, 1>}, {pipeline_mode = #tpu.pipeline_mode<synchronous>, transform_indices = @transform_21, window_bounds = array<i64: 2, 1>}]} {
    %c0_i32 = arith.constant 0 : i32
    %0 = arith.cmpi eq, %arg0, %c0_i32 : i32
    %1 = arith.extui %0 : i1 to i32
    %c0_i32_0 = arith.constant 0 : i32
    %2 = arith.cmpi ne, %1, %c0_i32_0 : i32
    scf.if %2 {
      %c0_98 = arith.constant 0 : index
      %c0_99 = arith.constant 0 : index
      %263 = vector.load %arg1[%c0_98, %c0_99] : memref<8x768xf32, #tpu.memory_space<vmem>>, vector<8x768xf32>
      %c0_100 = arith.constant 0 : index
      %c0_101 = arith.constant 0 : index
      %264 = vector.load %arg2[%c0_100, %c0_101] : memref<768x128xf32, #tpu.memory_space<vmem>>, vector<768x128xf32>
      %cst_102 = arith.constant dense<0.000000e+00> : vector<8x128xf32>
      %265 = tpu.matmul %263, %264, %cst_102 {dimension_numbers = #tpu.dot_dimension_numbers<[1], [0], [0], [1], [0, 0, 1, 1], [], []>} : vector<8x768xf32>, vector<768x128xf32>, vector<8x128xf32> -> vector<8x128xf32>
      %c0_103 = arith.constant 0 : index
      %c0_104 = arith.constant 0 : index
      %266 = vector.load %arg3[%c0_103, %c0_104] : memref<1x128xf32, #tpu.memory_space<vmem>>, vector<1x128xf32>
      %267 = vector.broadcast %266 : vector<1x128xf32> to vector<8x128xf32>
      %268 = arith.addf %265, %267 : vector<8x128xf32>
      %c0_105 = arith.constant 0 : index
      %c0_106 = arith.constant 0 : index
      %269 = vector.load %arg4[%c0_105, %c0_106] : memref<1x128xf32, #tpu.memory_space<vmem>>, vector<1x128xf32>
      %c0_107 = arith.constant 0 : index
      %c0_108 = arith.constant 0 : index
      %270 = vector.load %arg5[%c0_107, %c0_108] : memref<4x128xf32, #tpu.memory_space<vmem>>, vector<4x128xf32>
      %271 = vector.extract_strided_slice %268 {offsets = [0, 0], sizes = [4, 128], strides = [1, 1]} : vector<8x128xf32> to vector<4x128xf32>
      %272 = arith.addf %271, %270 : vector<4x128xf32>
      %273 = vector.extract_strided_slice %268 {offsets = [4, 0], sizes = [4, 128], strides = [1, 1]} : vector<8x128xf32> to vector<4x128xf32>
      %274 = arith.addf %273, %270 : vector<4x128xf32>
      %275 = tpu.concatenate %269, %272, %269, %274 in 0 : vector<1x128xf32>, vector<4x128xf32>, vector<1x128xf32>, vector<4x128xf32> -> vector<10x128xf32>
      %c0_109 = arith.constant 0 : index
      %c0_110 = arith.constant 0 : index
      %276 = vector.load %arg23[%c0_109, %c0_110] : memref<10x128xf32, #tpu.memory_space<vmem>>, vector<10x128xf32>
      tpu.vector_store %arg23[%c0_109, %c0_110], %275 {strides = array<i32>} : memref<10x128xf32, #tpu.memory_space<vmem>>, vector<10x128xf32>,
    } else {
    }
    %c0 = arith.constant 0 : index
    %c0_1 = arith.constant 0 : index
    %3 = vector.load %arg23[%c0, %c0_1] : memref<10x128xf32, #tpu.memory_space<vmem>>, vector<10x128xf32>
    %c0_2 = arith.constant 0 : index
    %c0_3 = arith.constant 0 : index
    %c0_4 = arith.constant 0 : index
    %4 = vector.load %arg6[%c0_2, %c0_3, %c0_4] : memref<1x1x128xf32, #tpu.memory_space<vmem>>, vector<1x1x128xf32>
    %5 = vector.shape_cast %4 : vector<1x1x128xf32> to vector<1x128xf32>
    %c0_5 = arith.constant 0 : index
    %c0_6 = arith.constant 0 : index
    %c0_7 = arith.constant 0 : index
    %6 = vector.load %arg7[%c0_5, %c0_6, %c0_7] : memref<1x1x128xf32, #tpu.memory_space<vmem>>, vector<1x1x128xf32>
    %7 = vector.shape_cast %6 : vector<1x1x128xf32> to vector<1x128xf32>
    %cst = arith.constant dense<0.000000e+00> : vector<10xf32>
    %8 = vector.multi_reduction <add>, %3, %cst [1] : vector<10x128xf32> to vector<10xf32>
    %9 = vector.shape_cast %8 : vector<10xf32> to vector<10x1xf32>
    %cst_8 = arith.constant 1.280000e+02 : f32
    %10 = vector.broadcast %cst_8 : f32 to vector<10x1xf32>
    %11 = arith.divf %9, %10 : vector<10x1xf32>
    %12 = vector.broadcast %11 : vector<10x1xf32> to vector<10x128xf32>
    %13 = arith.subf %3, %12 : vector<10x128xf32>
    %14 = arith.mulf %13, %13 : vector<10x128xf32>
    %cst_9 = arith.constant dense<0.000000e+00> : vector<10xf32>
    %15 = vector.multi_reduction <add>, %14, %cst_9 [1] : vector<10x128xf32> to vector<10xf32>
    %16 = vector.shape_cast %15 : vector<10xf32> to vector<10x1xf32>
    %cst_10 = arith.constant 1.280000e+02 : f32
    %17 = vector.broadcast %cst_10 : f32 to vector<10x1xf32>
    %18 = arith.divf %16, %17 : vector<10x1xf32>
    %19 = vector.broadcast %11 : vector<10x1xf32> to vector<10x128xf32>
    %20 = arith.subf %3, %19 : vector<10x128xf32>
    %cst_11 = arith.constant 9.99999997E-7 : f32
    %21 = vector.broadcast %cst_11 : f32 to vector<10x1xf32>
    %22 = arith.addf %18, %21 : vector<10x1xf32>
    %23 = math.rsqrt %22 : vector<10x1xf32>
    %24 = vector.broadcast %23 : vector<10x1xf32> to vector<10x128xf32>
    %25 = arith.mulf %20, %24 : vector<10x128xf32>
    %26 = vector.broadcast %5 : vector<1x128xf32> to vector<10x128xf32>
    %27 = arith.mulf %25, %26 : vector<10x128xf32>
    %28 = vector.broadcast %7 : vector<1x128xf32> to vector<10x128xf32>
    %29 = arith.addf %27, %28 : vector<10x128xf32>
    %30 = arith.truncf %29 : vector<10x128xf32> to vector<10x128xbf16>
    %c0_12 = arith.constant 0 : index
    %c0_13 = arith.constant 0 : index
    %c0_14 = arith.constant 0 : index
    %31 = vector.load %arg8[%c0_12, %c0_13, %c0_14] : memref<1x128x384xbf16, #tpu.memory_space<vmem>>, vector<1x128x384xbf16>
    %32 = vector.shape_cast %31 : vector<1x128x384xbf16> to vector<128x384xbf16>
    %cst_15 = arith.constant dense<0.000000e+00> : vector<10x384xf32>
    %33 = tpu.matmul %30, %32, %cst_15 {dimension_numbers = #tpu.dot_dimension_numbers<[1], [0], [0], [1], [0, 0, 1, 1], [], []>} : vector<10x128xbf16>, vector<128x384xbf16>, vector<10x384xf32> -> vector<10x384xf32>
    %c0_16 = arith.constant 0 : index
    %c0_17 = arith.constant 0 : index
    %c0_18 = arith.constant 0 : index
    %34 = vector.load %arg9[%c0_16, %c0_17, %c0_18] : memref<1x1x384xf32, #tpu.memory_space<vmem>>, vector<1x1x384xf32>
    %35 = vector.shape_cast %34 : vector<1x1x384xf32> to vector<1x384xf32>
    %36 = vector.broadcast %35 : vector<1x384xf32> to vector<10x384xf32>
    %37 = arith.addf %33, %36 : vector<10x384xf32>
    %38 = vector.extract_strided_slice %37 {offsets = [0, 0], sizes = [10, 128], strides = [1, 1]} : vector<10x384xf32> to vector<10x128xf32>
    %39 = vector.extract_strided_slice %37 {offsets = [0, 128], sizes = [10, 128], strides = [1, 1]} : vector<10x384xf32> to vector<10x128xf32>
    %40 = vector.extract_strided_slice %37 {offsets = [0, 256], sizes = [10, 128], strides = [1, 1]} : vector<10x384xf32> to vector<10x128xf32>
    %41 = vector.extract_strided_slice %38 {offsets = [0, 0], sizes = [5, 128], strides = [1, 1]} : vector<10x128xf32> to vector<5x128xf32>
    %42 = vector.extract_strided_slice %39 {offsets = [0, 0], sizes = [5, 128], strides = [1, 1]} : vector<10x128xf32> to vector<5x128xf32>
    %43 = vector.extract_strided_slice %40 {offsets = [0, 0], sizes = [5, 128], strides = [1, 1]} : vector<10x128xf32> to vector<5x128xf32>
    %44 = vector.extract_strided_slice %41 {offsets = [0, 0], sizes = [5, 32], strides = [1, 1]} : vector<5x128xf32> to vector<5x32xf32>
    %45 = vector.extract_strided_slice %42 {offsets = [0, 0], sizes = [5, 32], strides = [1, 1]} : vector<5x128xf32> to vector<5x32xf32>
    %46 = tpu.transpose %45, [1, 0] : vector<5x32xf32> -> vector<32x5xf32>
    %cst_19 = arith.constant dense<0.000000e+00> : vector<5x5xf32>
    %47 = tpu.matmul %44, %46, %cst_19 {dimension_numbers = #tpu.dot_dimension_numbers<[1], [0], [0], [1], [0, 0, 1, 1], [], []>} : vector<5x32xf32>, vector<32x5xf32>, vector<5x5xf32> -> vector<5x5xf32>
    %cst_20 = arith.constant 0.176776692 : f32
    %48 = vector.broadcast %cst_20 : f32 to vector<5x5xf32>
    %49 = arith.mulf %47, %48 : vector<5x5xf32>
    %cst_21 = arith.constant dense<0xFF800000> : vector<5xf32>
    %50 = vector.multi_reduction <maximumf>, %49, %cst_21 [1] : vector<5x5xf32> to vector<5xf32>
    %51 = vector.shape_cast %50 : vector<5xf32> to vector<5x1xf32>
    %52 = vector.broadcast %51 : vector<5x1xf32> to vector<5x5xf32>
    %53 = arith.subf %49, %52 : vector<5x5xf32>
    %54 = math.exp %53 : vector<5x5xf32>
    %cst_22 = arith.constant dense<0.000000e+00> : vector<5xf32>
    %55 = vector.multi_reduction <add>, %54, %cst_22 [1] : vector<5x5xf32> to vector<5xf32>
    %56 = vector.shape_cast %55 : vector<5xf32> to vector<5x1xf32>
    %57 = tpu.reciprocal %56 {approx = true} : vector<5x1xf32> -> vector<5x1xf32>
    %58 = vector.broadcast %57 : vector<5x1xf32> to vector<5x5xf32>
    %59 = arith.mulf %54, %58 : vector<5x5xf32>
    %60 = vector.extract_strided_slice %43 {offsets = [0, 0], sizes = [5, 32], strides = [1, 1]} : vector<5x128xf32> to vector<5x32xf32>
    %cst_23 = arith.constant dense<0.000000e+00> : vector<5x32xf32>
    %61 = tpu.matmul %59, %60, %cst_23 {dimension_numbers = #tpu.dot_dimension_numbers<[1], [0], [0], [1], [0, 0, 1, 1], [], []>} : vector<5x5xf32>, vector<5x32xf32>, vector<5x32xf32> -> vector<5x32xf32>
    %62 = vector.extract_strided_slice %41 {offsets = [0, 32], sizes = [5, 32], strides = [1, 1]} : vector<5x128xf32> to vector<5x32xf32>
    %63 = vector.extract_strided_slice %42 {offsets = [0, 32], sizes = [5, 32], strides = [1, 1]} : vector<5x128xf32> to vector<5x32xf32>
    %64 = tpu.transpose %63, [1, 0] : vector<5x32xf32> -> vector<32x5xf32>
    %cst_24 = arith.constant dense<0.000000e+00> : vector<5x5xf32>
    %65 = tpu.matmul %62, %64, %cst_24 {dimension_numbers = #tpu.dot_dimension_numbers<[1], [0], [0], [1], [0, 0, 1, 1], [], []>} : vector<5x32xf32>, vector<32x5xf32>, vector<5x5xf32> -> vector<5x5xf32>
    %cst_25 = arith.constant 0.176776692 : f32
    %66 = vector.broadcast %cst_25 : f32 to vector<5x5xf32>
    %67 = arith.mulf %65, %66 : vector<5x5xf32>
    %cst_26 = arith.constant dense<0xFF800000> : vector<5xf32>
    %68 = vector.multi_reduction <maximumf>, %67, %cst_26 [1] : vector<5x5xf32> to vector<5xf32>
    %69 = vector.shape_cast %68 : vector<5xf32> to vector<5x1xf32>
    %70 = vector.broadcast %69 : vector<5x1xf32> to vector<5x5xf32>
    %71 = arith.subf %67, %70 : vector<5x5xf32>
    %72 = math.exp %71 : vector<5x5xf32>
    %cst_27 = arith.constant dense<0.000000e+00> : vector<5xf32>
    %73 = vector.multi_reduction <add>, %72, %cst_27 [1] : vector<5x5xf32> to vector<5xf32>
    %74 = vector.shape_cast %73 : vector<5xf32> to vector<5x1xf32>
    %75 = tpu.reciprocal %74 {approx = true} : vector<5x1xf32> -> vector<5x1xf32>
    %76 = vector.broadcast %75 : vector<5x1xf32> to vector<5x5xf32>
    %77 = arith.mulf %72, %76 : vector<5x5xf32>
    %78 = vector.extract_strided_slice %43 {offsets = [0, 32], sizes = [5, 32], strides = [1, 1]} : vector<5x128xf32> to vector<5x32xf32>
    %cst_28 = arith.constant dense<0.000000e+00> : vector<5x32xf32>
    %79 = tpu.matmul %77, %78, %cst_28 {dimension_numbers = #tpu.dot_dimension_numbers<[1], [0], [0], [1], [0, 0, 1, 1], [], []>} : vector<5x5xf32>, vector<5x32xf32>, vector<5x32xf32> -> vector<5x32xf32>
    %80 = vector.extract_strided_slice %41 {offsets = [0, 64], sizes = [5, 32], strides = [1, 1]} : vector<5x128xf32> to vector<5x32xf32>
    %81 = vector.extract_strided_slice %42 {offsets = [0, 64], sizes = [5, 32], strides = [1, 1]} : vector<5x128xf32> to vector<5x32xf32>
    %82 = tpu.transpose %81, [1, 0] : vector<5x32xf32> -> vector<32x5xf32>
    %cst_29 = arith.constant dense<0.000000e+00> : vector<5x5xf32>
    %83 = tpu.matmul %80, %82, %cst_29 {dimension_numbers = #tpu.dot_dimension_numbers<[1], [0], [0], [1], [0, 0, 1, 1], [], []>} : vector<5x32xf32>, vector<32x5xf32>, vector<5x5xf32> -> vector<5x5xf32>
    %cst_30 = arith.constant 0.176776692 : f32
    %84 = vector.broadcast %cst_30 : f32 to vector<5x5xf32>
    %85 = arith.mulf %83, %84 : vector<5x5xf32>
    %cst_31 = arith.constant dense<0xFF800000> : vector<5xf32>
    %86 = vector.multi_reduction <maximumf>, %85, %cst_31 [1] : vector<5x5xf32> to vector<5xf32>
    %87 = vector.shape_cast %86 : vector<5xf32> to vector<5x1xf32>
    %88 = vector.broadcast %87 : vector<5x1xf32> to vector<5x5xf32>
    %89 = arith.subf %85, %88 : vector<5x5xf32>
    %90 = math.exp %89 : vector<5x5xf32>
    %cst_32 = arith.constant dense<0.000000e+00> : vector<5xf32>
    %91 = vector.multi_reduction <add>, %90, %cst_32 [1] : vector<5x5xf32> to vector<5xf32>
    %92 = vector.shape_cast %91 : vector<5xf32> to vector<5x1xf32>
    %93 = tpu.reciprocal %92 {approx = true} : vector<5x1xf32> -> vector<5x1xf32>
    %94 = vector.broadcast %93 : vector<5x1xf32> to vector<5x5xf32>
    %95 = arith.mulf %90, %94 : vector<5x5xf32>
    %96 = vector.extract_strided_slice %43 {offsets = [0, 64], sizes = [5, 32], strides = [1, 1]} : vector<5x128xf32> to vector<5x32xf32>
    %cst_33 = arith.constant dense<0.000000e+00> : vector<5x32xf32>
    %97 = tpu.matmul %95, %96, %cst_33 {dimension_numbers = #tpu.dot_dimension_numbers<[1], [0], [0], [1], [0, 0, 1, 1], [], []>} : vector<5x5xf32>, vector<5x32xf32>, vector<5x32xf32> -> vector<5x32xf32>
    %98 = vector.extract_strided_slice %41 {offsets = [0, 96], sizes = [5, 32], strides = [1, 1]} : vector<5x128xf32> to vector<5x32xf32>
    %99 = vector.extract_strided_slice %42 {offsets = [0, 96], sizes = [5, 32], strides = [1, 1]} : vector<5x128xf32> to vector<5x32xf32>
    %100 = tpu.transpose %99, [1, 0] : vector<5x32xf32> -> vector<32x5xf32>
    %cst_34 = arith.constant dense<0.000000e+00> : vector<5x5xf32>
    %101 = tpu.matmul %98, %100, %cst_34 {dimension_numbers = #tpu.dot_dimension_numbers<[1], [0], [0], [1], [0, 0, 1, 1], [], []>} : vector<5x32xf32>, vector<32x5xf32>, vector<5x5xf32> -> vector<5x5xf32>
    %cst_35 = arith.constant 0.176776692 : f32
    %102 = vector.broadcast %cst_35 : f32 to vector<5x5xf32>
    %103 = arith.mulf %101, %102 : vector<5x5xf32>
    %cst_36 = arith.constant dense<0xFF800000> : vector<5xf32>
    %104 = vector.multi_reduction <maximumf>, %103, %cst_36 [1] : vector<5x5xf32> to vector<5xf32>
    %105 = vector.shape_cast %104 : vector<5xf32> to vector<5x1xf32>
    %106 = vector.broadcast %105 : vector<5x1xf32> to vector<5x5xf32>
    %107 = arith.subf %103, %106 : vector<5x5xf32>
    %108 = math.exp %107 : vector<5x5xf32>
    %cst_37 = arith.constant dense<0.000000e+00> : vector<5xf32>
    %109 = vector.multi_reduction <add>, %108, %cst_37 [1] : vector<5x5xf32> to vector<5xf32>
    %110 = vector.shape_cast %109 : vector<5xf32> to vector<5x1xf32>
    %111 = tpu.reciprocal %110 {approx = true} : vector<5x1xf32> -> vector<5x1xf32>
    %112 = vector.broadcast %111 : vector<5x1xf32> to vector<5x5xf32>
    %113 = arith.mulf %108, %112 : vector<5x5xf32>
    %114 = vector.extract_strided_slice %43 {offsets = [0, 96], sizes = [5, 32], strides = [1, 1]} : vector<5x128xf32> to vector<5x32xf32>
    %cst_38 = arith.constant dense<0.000000e+00> : vector<5x32xf32>
    %115 = tpu.matmul %113, %114, %cst_38 {dimension_numbers = #tpu.dot_dimension_numbers<[1], [0], [0], [1], [0, 0, 1, 1], [], []>} : vector<5x5xf32>, vector<5x32xf32>, vector<5x32xf32> -> vector<5x32xf32>
    %116 = tpu.concatenate %61, %79, %97, %115 in 1 : vector<5x32xf32>, vector<5x32xf32>, vector<5x32xf32>, vector<5x32xf32> -> vector<5x128xf32>
    %117 = vector.extract_strided_slice %38 {offsets = [5, 0], sizes = [5, 128], strides = [1, 1]} : vector<10x128xf32> to vector<5x128xf32>
    %118 = vector.extract_strided_slice %39 {offsets = [5, 0], sizes = [5, 128], strides = [1, 1]} : vector<10x128xf32> to vector<5x128xf32>
    %119 = vector.extract_strided_slice %40 {offsets = [5, 0], sizes = [5, 128], strides = [1, 1]} : vector<10x128xf32> to vector<5x128xf32>
    %120 = vector.extract_strided_slice %117 {offsets = [0, 0], sizes = [5, 32], strides = [1, 1]} : vector<5x128xf32> to vector<5x32xf32>
    %121 = vector.extract_strided_slice %118 {offsets = [0, 0], sizes = [5, 32], strides = [1, 1]} : vector<5x128xf32> to vector<5x32xf32>
    %122 = tpu.transpose %121, [1, 0] : vector<5x32xf32> -> vector<32x5xf32>
    %cst_39 = arith.constant dense<0.000000e+00> : vector<5x5xf32>
    %123 = tpu.matmul %120, %122, %cst_39 {dimension_numbers = #tpu.dot_dimension_numbers<[1], [0], [0], [1], [0, 0, 1, 1], [], []>} : vector<5x32xf32>, vector<32x5xf32>, vector<5x5xf32> -> vector<5x5xf32>
    %cst_40 = arith.constant 0.176776692 : f32
    %124 = vector.broadcast %cst_40 : f32 to vector<5x5xf32>
    %125 = arith.mulf %123, %124 : vector<5x5xf32>
    %cst_41 = arith.constant dense<0xFF800000> : vector<5xf32>
    %126 = vector.multi_reduction <maximumf>, %125, %cst_41 [1] : vector<5x5xf32> to vector<5xf32>
    %127 = vector.shape_cast %126 : vector<5xf32> to vector<5x1xf32>
    %128 = vector.broadcast %127 : vector<5x1xf32> to vector<5x5xf32>
    %129 = arith.subf %125, %128 : vector<5x5xf32>
    %130 = math.exp %129 : vector<5x5xf32>
    %cst_42 = arith.constant dense<0.000000e+00> : vector<5xf32>
    %131 = vector.multi_reduction <add>, %130, %cst_42 [1] : vector<5x5xf32> to vector<5xf32>
    %132 = vector.shape_cast %131 : vector<5xf32> to vector<5x1xf32>
    %133 = tpu.reciprocal %132 {approx = true} : vector<5x1xf32> -> vector<5x1xf32>
    %134 = vector.broadcast %133 : vector<5x1xf32> to vector<5x5xf32>
    %135 = arith.mulf %130, %134 : vector<5x5xf32>
    %136 = vector.extract_strided_slice %119 {offsets = [0, 0], sizes = [5, 32], strides = [1, 1]} : vector<5x128xf32> to vector<5x32xf32>
    %cst_43 = arith.constant dense<0.000000e+00> : vector<5x32xf32>
    %137 = tpu.matmul %135, %136, %cst_43 {dimension_numbers = #tpu.dot_dimension_numbers<[1], [0], [0], [1], [0, 0, 1, 1], [], []>} : vector<5x5xf32>, vector<5x32xf32>, vector<5x32xf32> -> vector<5x32xf32>
    %138 = vector.extract_strided_slice %117 {offsets = [0, 32], sizes = [5, 32], strides = [1, 1]} : vector<5x128xf32> to vector<5x32xf32>
    %139 = vector.extract_strided_slice %118 {offsets = [0, 32], sizes = [5, 32], strides = [1, 1]} : vector<5x128xf32> to vector<5x32xf32>
    %140 = tpu.transpose %139, [1, 0] : vector<5x32xf32> -> vector<32x5xf32>
    %cst_44 = arith.constant dense<0.000000e+00> : vector<5x5xf32>
    %141 = tpu.matmul %138, %140, %cst_44 {dimension_numbers = #tpu.dot_dimension_numbers<[1], [0], [0], [1], [0, 0, 1, 1], [], []>} : vector<5x32xf32>, vector<32x5xf32>, vector<5x5xf32> -> vector<5x5xf32>
    %cst_45 = arith.constant 0.176776692 : f32
    %142 = vector.broadcast %cst_45 : f32 to vector<5x5xf32>
    %143 = arith.mulf %141, %142 : vector<5x5xf32>
    %cst_46 = arith.constant dense<0xFF800000> : vector<5xf32>
    %144 = vector.multi_reduction <maximumf>, %143, %cst_46 [1] : vector<5x5xf32> to vector<5xf32>
    %145 = vector.shape_cast %144 : vector<5xf32> to vector<5x1xf32>
    %146 = vector.broadcast %145 : vector<5x1xf32> to vector<5x5xf32>
    %147 = arith.subf %143, %146 : vector<5x5xf32>
    %148 = math.exp %147 : vector<5x5xf32>
    %cst_47 = arith.constant dense<0.000000e+00> : vector<5xf32>
    %149 = vector.multi_reduction <add>, %148, %cst_47 [1] : vector<5x5xf32> to vector<5xf32>
    %150 = vector.shape_cast %149 : vector<5xf32> to vector<5x1xf32>
    %151 = tpu.reciprocal %150 {approx = true} : vector<5x1xf32> -> vector<5x1xf32>
    %152 = vector.broadcast %151 : vector<5x1xf32> to vector<5x5xf32>
    %153 = arith.mulf %148, %152 : vector<5x5xf32>
    %154 = vector.extract_strided_slice %119 {offsets = [0, 32], sizes = [5, 32], strides = [1, 1]} : vector<5x128xf32> to vector<5x32xf32>
    %cst_48 = arith.constant dense<0.000000e+00> : vector<5x32xf32>
    %155 = tpu.matmul %153, %154, %cst_48 {dimension_numbers = #tpu.dot_dimension_numbers<[1], [0], [0], [1], [0, 0, 1, 1], [], []>} : vector<5x5xf32>, vector<5x32xf32>, vector<5x32xf32> -> vector<5x32xf32>
    %156 = vector.extract_strided_slice %117 {offsets = [0, 64], sizes = [5, 32], strides = [1, 1]} : vector<5x128xf32> to vector<5x32xf32>
    %157 = vector.extract_strided_slice %118 {offsets = [0, 64], sizes = [5, 32], strides = [1, 1]} : vector<5x128xf32> to vector<5x32xf32>
    %158 = tpu.transpose %157, [1, 0] : vector<5x32xf32> -> vector<32x5xf32>
    %cst_49 = arith.constant dense<0.000000e+00> : vector<5x5xf32>
    %159 = tpu.matmul %156, %158, %cst_49 {dimension_numbers = #tpu.dot_dimension_numbers<[1], [0], [0], [1], [0, 0, 1, 1], [], []>} : vector<5x32xf32>, vector<32x5xf32>, vector<5x5xf32> -> vector<5x5xf32>
    %cst_50 = arith.constant 0.176776692 : f32
    %160 = vector.broadcast %cst_50 : f32 to vector<5x5xf32>
    %161 = arith.mulf %159, %160 : vector<5x5xf32>
    %cst_51 = arith.constant dense<0xFF800000> : vector<5xf32>
    %162 = vector.multi_reduction <maximumf>, %161, %cst_51 [1] : vector<5x5xf32> to vector<5xf32>
    %163 = vector.shape_cast %162 : vector<5xf32> to vector<5x1xf32>
    %164 = vector.broadcast %163 : vector<5x1xf32> to vector<5x5xf32>
    %165 = arith.subf %161, %164 : vector<5x5xf32>
    %166 = math.exp %165 : vector<5x5xf32>
    %cst_52 = arith.constant dense<0.000000e+00> : vector<5xf32>
    %167 = vector.multi_reduction <add>, %166, %cst_52 [1] : vector<5x5xf32> to vector<5xf32>
    %168 = vector.shape_cast %167 : vector<5xf32> to vector<5x1xf32>
    %169 = tpu.reciprocal %168 {approx = true} : vector<5x1xf32> -> vector<5x1xf32>
    %170 = vector.broadcast %169 : vector<5x1xf32> to vector<5x5xf32>
    %171 = arith.mulf %166, %170 : vector<5x5xf32>
    %172 = vector.extract_strided_slice %119 {offsets = [0, 64], sizes = [5, 32], strides = [1, 1]} : vector<5x128xf32> to vector<5x32xf32>
    %cst_53 = arith.constant dense<0.000000e+00> : vector<5x32xf32>
    %173 = tpu.matmul %171, %172, %cst_53 {dimension_numbers = #tpu.dot_dimension_numbers<[1], [0], [0], [1], [0, 0, 1, 1], [], []>} : vector<5x5xf32>, vector<5x32xf32>, vector<5x32xf32> -> vector<5x32xf32>
    %174 = vector.extract_strided_slice %117 {offsets = [0, 96], sizes = [5, 32], strides = [1, 1]} : vector<5x128xf32> to vector<5x32xf32>
    %175 = vector.extract_strided_slice %118 {offsets = [0, 96], sizes = [5, 32], strides = [1, 1]} : vector<5x128xf32> to vector<5x32xf32>
    %176 = tpu.transpose %175, [1, 0] : vector<5x32xf32> -> vector<32x5xf32>
    %cst_54 = arith.constant dense<0.000000e+00> : vector<5x5xf32>
    %177 = tpu.matmul %174, %176, %cst_54 {dimension_numbers = #tpu.dot_dimension_numbers<[1], [0], [0], [1], [0, 0, 1, 1], [], []>} : vector<5x32xf32>, vector<32x5xf32>, vector<5x5xf32> -> vector<5x5xf32>
    %cst_55 = arith.constant 0.176776692 : f32
    %178 = vector.broadcast %cst_55 : f32 to vector<5x5xf32>
    %179 = arith.mulf %177, %178 : vector<5x5xf32>
    %cst_56 = arith.constant dense<0xFF800000> : vector<5xf32>
    %180 = vector.multi_reduction <maximumf>, %179, %cst_56 [1] : vector<5x5xf32> to vector<5xf32>
    %181 = vector.shape_cast %180 : vector<5xf32> to vector<5x1xf32>
    %182 = vector.broadcast %181 : vector<5x1xf32> to vector<5x5xf32>
    %183 = arith.subf %179, %182 : vector<5x5xf32>
    %184 = math.exp %183 : vector<5x5xf32>
    %cst_57 = arith.constant dense<0.000000e+00> : vector<5xf32>
    %185 = vector.multi_reduction <add>, %184, %cst_57 [1] : vector<5x5xf32> to vector<5xf32>
    %186 = vector.shape_cast %185 : vector<5xf32> to vector<5x1xf32>
    %187 = tpu.reciprocal %186 {approx = true} : vector<5x1xf32> -> vector<5x1xf32>
    %188 = vector.broadcast %187 : vector<5x1xf32> to vector<5x5xf32>
    %189 = arith.mulf %184, %188 : vector<5x5xf32>
    %190 = vector.extract_strided_slice %119 {offsets = [0, 96], sizes = [5, 32], strides = [1, 1]} : vector<5x128xf32> to vector<5x32xf32>
    %cst_58 = arith.constant dense<0.000000e+00> : vector<5x32xf32>
    %191 = tpu.matmul %189, %190, %cst_58 {dimension_numbers = #tpu.dot_dimension_numbers<[1], [0], [0], [1], [0, 0, 1, 1], [], []>} : vector<5x5xf32>, vector<5x32xf32>, vector<5x32xf32> -> vector<5x32xf32>
    %192 = tpu.concatenate %137, %155, %173, %191 in 1 : vector<5x32xf32>, vector<5x32xf32>, vector<5x32xf32>, vector<5x32xf32> -> vector<5x128xf32>
    %193 = tpu.concatenate %116, %192 in 0 : vector<5x128xf32>, vector<5x128xf32> -> vector<10x128xf32>
    %194 = arith.truncf %193 : vector<10x128xf32> to vector<10x128xbf16>
    %c0_59 = arith.constant 0 : index
    %c0_60 = arith.constant 0 : index
    %c0_61 = arith.constant 0 : index
    %195 = vector.load %arg10[%c0_59, %c0_60, %c0_61] : memref<1x128x128xbf16, #tpu.memory_space<vmem>>, vector<1x128x128xbf16>
    %196 = vector.shape_cast %195 : vector<1x128x128xbf16> to vector<128x128xbf16>
    %cst_62 = arith.constant dense<0.000000e+00> : vector<10x128xf32>
    %197 = tpu.matmul %194, %196, %cst_62 {dimension_numbers = #tpu.dot_dimension_numbers<[1], [0], [0], [1], [0, 0, 1, 1], [], []>} : vector<10x128xbf16>, vector<128x128xbf16>, vector<10x128xf32> -> vector<10x128xf32>
    %c0_63 = arith.constant 0 : index
    %c0_64 = arith.constant 0 : index
    %c0_65 = arith.constant 0 : index
    %198 = vector.load %arg11[%c0_63, %c0_64, %c0_65] : memref<1x1x128xf32, #tpu.memory_space<vmem>>, vector<1x1x128xf32>
    %199 = vector.shape_cast %198 : vector<1x1x128xf32> to vector<1x128xf32>
    %200 = vector.broadcast %199 : vector<1x128xf32> to vector<10x128xf32>
    %201 = arith.addf %197, %200 : vector<10x128xf32>
    %202 = arith.addf %3, %201 : vector<10x128xf32>
    %c0_66 = arith.constant 0 : index
    %c0_67 = arith.constant 0 : index
    %c0_68 = arith.constant 0 : index
    %203 = vector.load %arg12[%c0_66, %c0_67, %c0_68] : memref<1x1x128xf32, #tpu.memory_space<vmem>>, vector<1x1x128xf32>
    %204 = vector.shape_cast %203 : vector<1x1x128xf32> to vector<1x128xf32>
    %c0_69 = arith.constant 0 : index
    %c0_70 = arith.constant 0 : index
    %c0_71 = arith.constant 0 : index
    %205 = vector.load %arg13[%c0_69, %c0_70, %c0_71] : memref<1x1x128xf32, #tpu.memory_space<vmem>>, vector<1x1x128xf32>
    %206 = vector.shape_cast %205 : vector<1x1x128xf32> to vector<1x128xf32>
    %cst_72 = arith.constant dense<0.000000e+00> : vector<10xf32>
    %207 = vector.multi_reduction <add>, %202, %cst_72 [1] : vector<10x128xf32> to vector<10xf32>
    %208 = vector.shape_cast %207 : vector<10xf32> to vector<10x1xf32>
    %cst_73 = arith.constant 1.280000e+02 : f32
    %209 = vector.broadcast %cst_73 : f32 to vector<10x1xf32>
    %210 = arith.divf %208, %209 : vector<10x1xf32>
    %211 = vector.broadcast %210 : vector<10x1xf32> to vector<10x128xf32>
    %212 = arith.subf %202, %211 : vector<10x128xf32>
    %213 = arith.mulf %212, %212 : vector<10x128xf32>
    %cst_74 = arith.constant dense<0.000000e+00> : vector<10xf32>
    %214 = vector.multi_reduction <add>, %213, %cst_74 [1] : vector<10x128xf32> to vector<10xf32>
    %215 = vector.shape_cast %214 : vector<10xf32> to vector<10x1xf32>
    %cst_75 = arith.constant 1.280000e+02 : f32
    %216 = vector.broadcast %cst_75 : f32 to vector<10x1xf32>
    %217 = arith.divf %215, %216 : vector<10x1xf32>
    %218 = vector.broadcast %210 : vector<10x1xf32> to vector<10x128xf32>
    %219 = arith.subf %202, %218 : vector<10x128xf32>
    %cst_76 = arith.constant 9.99999997E-7 : f32
    %220 = vector.broadcast %cst_76 : f32 to vector<10x1xf32>
    %221 = arith.addf %217, %220 : vector<10x1xf32>
    %222 = math.rsqrt %221 : vector<10x1xf32>
    %223 = vector.broadcast %222 : vector<10x1xf32> to vector<10x128xf32>
    %224 = arith.mulf %219, %223 : vector<10x128xf32>
    %225 = vector.broadcast %204 : vector<1x128xf32> to vector<10x128xf32>
    %226 = arith.mulf %224, %225 : vector<10x128xf32>
    %227 = vector.broadcast %206 : vector<1x128xf32> to vector<10x128xf32>
    %228 = arith.addf %226, %227 : vector<10x128xf32>
    %229 = arith.truncf %228 : vector<10x128xf32> to vector<10x128xbf16>
    %c0_77 = arith.constant 0 : index
    %c0_78 = arith.constant 0 : index
    %c0_79 = arith.constant 0 : index
    %230 = vector.load %arg14[%c0_77, %c0_78, %c0_79] : memref<1x128x256xbf16, #tpu.memory_space<vmem>>, vector<1x128x256xbf16>
    %231 = vector.shape_cast %230 : vector<1x128x256xbf16> to vector<128x256xbf16>
    %cst_80 = arith.constant dense<0.000000e+00> : vector<10x256xf32>
    %232 = tpu.matmul %229, %231, %cst_80 {dimension_numbers = #tpu.dot_dimension_numbers<[1], [0], [0], [1], [0, 0, 1, 1], [], []>} : vector<10x128xbf16>, vector<128x256xbf16>, vector<10x256xf32> -> vector<10x256xf32>
    %c0_81 = arith.constant 0 : index
    %c0_82 = arith.constant 0 : index
    %c0_83 = arith.constant 0 : index
    %233 = vector.load %arg15[%c0_81, %c0_82, %c0_83] : memref<1x1x256xf32, #tpu.memory_space<vmem>>, vector<1x1x256xf32>
    %234 = vector.shape_cast %233 : vector<1x1x256xf32> to vector<1x256xf32>
    %235 = vector.broadcast %234 : vector<1x256xf32> to vector<10x256xf32>
    %236 = arith.addf %232, %235 : vector<10x256xf32>
    %cst_84 = arith.constant 5.000000e-01 : f32
    %237 = vector.broadcast %cst_84 : f32 to vector<10x256xf32>
    %238 = arith.mulf %237, %236 : vector<10x256xf32>
    %cst_85 = arith.constant 4.471500e-02 : f32
    %239 = vector.broadcast %cst_85 : f32 to vector<10x256xf32>
    %240 = arith.mulf %239, %236 : vector<10x256xf32>
    %241 = arith.mulf %240, %236 : vector<10x256xf32>
    %242 = arith.mulf %241, %236 : vector<10x256xf32>
    %243 = arith.addf %236, %242 : vector<10x256xf32>
    %cst_86 = arith.constant 0.797884583 : f32
    %244 = vector.broadcast %cst_86 : f32 to vector<10x256xf32>
    %245 = arith.mulf %244, %243 : vector<10x256xf32>
    %246 = math.tanh %245 : vector<10x256xf32>
    %cst_87 = arith.constant 1.000000e+00 : f32
    %247 = vector.broadcast %cst_87 : f32 to vector<10x256xf32>
    %248 = arith.addf %247, %246 : vector<10x256xf32>
    %249 = arith.mulf %238, %248 : vector<10x256xf32>
    %250 = arith.truncf %249 : vector<10x256xf32> to vector<10x256xbf16>
    %c0_88 = arith.constant 0 : index
    %c0_89 = arith.constant 0 : index
    %c0_90 = arith.constant 0 : index
    %251 = vector.load %arg16[%c0_88, %c0_89, %c0_90] : memref<1x256x128xbf16, #tpu.memory_space<vmem>>, vector<1x256x128xbf16>
    %252 = vector.shape_cast %251 : vector<1x256x128xbf16> to vector<256x128xbf16>
    %cst_91 = arith.constant dense<0.000000e+00> : vector<10x128xf32>
    %253 = tpu.matmul %250, %252, %cst_91 {dimension_numbers = #tpu.dot_dimension_numbers<[1], [0], [0], [1], [0, 0, 1, 1], [], []>} : vector<10x256xbf16>, vector<256x128xbf16>, vector<10x128xf32> -> vector<10x128xf32>
    %c0_92 = arith.constant 0 : index
    %c0_93 = arith.constant 0 : index
    %c0_94 = arith.constant 0 : index
    %254 = vector.load %arg17[%c0_92, %c0_93, %c0_94] : memref<1x1x128xf32, #tpu.memory_space<vmem>>, vector<1x1x128xf32>
    %255 = vector.shape_cast %254 : vector<1x1x128xf32> to vector<1x128xf32>
    %256 = vector.broadcast %255 : vector<1x128xf32> to vector<10x128xf32>
    %257 = arith.addf %253, %256 : vector<10x128xf32>
    %258 = arith.addf %202, %257 : vector<10x128xf32>
    %c0_95 = arith.constant 0 : index
    %c0_96 = arith.constant 0 : index
    %259 = vector.load %arg23[%c0_95, %c0_96] : memref<10x128xf32, #tpu.memory_space<vmem>>, vector<10x128xf32>
    tpu.vector_store %arg23[%c0_95, %c0_96], %258 {strides = array<i32>} : memref<10x128xf32, #tpu.memory_space<vmem>>, vector<10x128xf32>,
    %c1_i32 = arith.constant 1 : i32
    %260 = arith.cmpi eq, %arg0, %c1_i32 : i32
    %261 = arith.extui %260 : i1 to i32
    %c0_i32_97 = arith.constant 0 : i32
    %262 = arith.cmpi ne, %261, %c0_i32_97 : i32
    scf.if %262 {
      %263 = vector.extract_strided_slice %258 {offsets = [0, 0], sizes = [1, 128], strides = [1, 1]} : vector<10x128xf32> to vector<1x128xf32>
      %264 = vector.extract_strided_slice %258 {offsets = [5, 0], sizes = [1, 128], strides = [1, 1]} : vector<10x128xf32> to vector<1x128xf32>
      %265 = tpu.concatenate %263, %264 in 0 : vector<1x128xf32>, vector<1x128xf32> -> vector<2x128xf32>
      %c0_98 = arith.constant 0 : index
      %c0_99 = arith.constant 0 : index
      %266 = vector.load %arg18[%c0_98, %c0_99] : memref<1x128xf32, #tpu.memory_space<vmem>>, vector<1x128xf32>
      %c0_100 = arith.constant 0 : index
      %c0_101 = arith.constant 0 : index
      %267 = vector.load %arg19[%c0_100, %c0_101] : memref<1x128xf32, #tpu.memory_space<vmem>>, vector<1x128xf32>
      %cst_102 = arith.constant dense<0.000000e+00> : vector<2xf32>
      %268 = vector.multi_reduction <add>, %265, %cst_102 [1] : vector<2x128xf32> to vector<2xf32>
      %269 = vector.shape_cast %268 : vector<2xf32> to vector<2x1xf32>
      %cst_103 = arith.constant 1.280000e+02 : f32
      %270 = vector.broadcast %cst_103 : f32 to vector<2x1xf32>
      %271 = arith.divf %269, %270 : vector<2x1xf32>
      %272 = vector.broadcast %271 : vector<2x1xf32> to vector<2x128xf32>
      %273 = arith.subf %265, %272 : vector<2x128xf32>
      %274 = arith.mulf %273, %273 : vector<2x128xf32>
      %cst_104 = arith.constant dense<0.000000e+00> : vector<2xf32>
      %275 = vector.multi_reduction <add>, %274, %cst_104 [1] : vector<2x128xf32> to vector<2xf32>
      %276 = vector.shape_cast %275 : vector<2xf32> to vector<2x1xf32>
      %cst_105 = arith.constant 1.280000e+02 : f32
      %277 = vector.broadcast %cst_105 : f32 to vector<2x1xf32>
      %278 = arith.divf %276, %277 : vector<2x1xf32>
      %279 = vector.broadcast %271 : vector<2x1xf32> to vector<2x128xf32>
      %280 = arith.subf %265, %279 : vector<2x128xf32>
      %cst_106 = arith.constant 9.99999997E-7 : f32
      %281 = vector.broadcast %cst_106 : f32 to vector<2x1xf32>
      %282 = arith.addf %278, %281 : vector<2x1xf32>
      %283 = math.rsqrt %282 : vector<2x1xf32>
      %284 = vector.broadcast %283 : vector<2x1xf32> to vector<2x128xf32>
      %285 = arith.mulf %280, %284 : vector<2x128xf32>
      %286 = vector.broadcast %266 : vector<1x128xf32> to vector<2x128xf32>
      %287 = arith.mulf %285, %286 : vector<2x128xf32>
      %288 = vector.broadcast %267 : vector<1x128xf32> to vector<2x128xf32>
      %289 = arith.addf %287, %288 : vector<2x128xf32>
      %c0_107 = arith.constant 0 : index
      %c0_108 = arith.constant 0 : index
      %290 = vector.load %arg20[%c0_107, %c0_108] : memref<128x1xf32, #tpu.memory_space<vmem>>, vector<128x1xf32>
      %cst_109 = arith.constant dense<0.000000e+00> : vector<2x1xf32>
      %291 = tpu.matmul %289, %290, %cst_109 {dimension_numbers = #tpu.dot_dimension_numbers<[1], [0], [0], [1], [0, 0, 1, 1], [], []>} : vector<2x128xf32>, vector<128x1xf32>, vector<2x1xf32> -> vector<2x1xf32>
      %c0_110 = arith.constant 0 : index
      %c0_111 = arith.constant 0 : index
      %292 = vector.load %arg21[%c0_110, %c0_111] : memref<1x1xf32, #tpu.memory_space<vmem>>, vector<1x1xf32>
      %293 = vector.broadcast %292 : vector<1x1xf32> to vector<2x1xf32>
      %294 = arith.addf %291, %293 : vector<2x1xf32>
      %c0_112 = arith.constant 0 : index
      %c0_113 = arith.constant 0 : index
      %295 = vector.load %arg22[%c0_112, %c0_113] : memref<2x1xf32, #tpu.memory_space<vmem>>, vector<2x1xf32>
      tpu.vector_store %arg22[%c0_112, %c0_113], %294 {strides = array<i32>} : memref<2x1xf32, #tpu.memory_space<vmem>>, vector<2x1xf32>,
    } else {
    }
    return
  }
  func.func @transform_0(%arg0: i32) -> (i32, i32) {
    %c0_i32 = arith.constant 0 : i32
    %c0_i32_0 = arith.constant 0 : i32
    %c0_i32_1 = arith.constant 0 : i32
    return %c0_i32, %c0_i32_0 : i32, i32
  }
  func.func @transform_1(%arg0: i32) -> (i32, i32) {
    %c0_i32 = arith.constant 0 : i32
    %c0_i32_0 = arith.constant 0 : i32
    %c0_i32_1 = arith.constant 0 : i32
    return %c0_i32, %c0_i32_0 : i32, i32
  }
  func.func @transform_2(%arg0: i32) -> (i32, i32) {
    %c0_i32 = arith.constant 0 : i32
    %c0_i32_0 = arith.constant 0 : i32
    %c0_i32_1 = arith.constant 0 : i32
    return %c0_i32, %c0_i32_0 : i32, i32
  }
  func.func @transform_3(%arg0: i32) -> (i32, i32) {
    %c0_i32 = arith.constant 0 : i32
    %c0_i32_0 = arith.constant 0 : i32
    %c0_i32_1 = arith.constant 0 : i32
    return %c0_i32, %c0_i32_0 : i32, i32
  }
  func.func @transform_4(%arg0: i32) -> (i32, i32) {
    %c0_i32 = arith.constant 0 : i32
    %c0_i32_0 = arith.constant 0 : i32
    %c0_i32_1 = arith.constant 0 : i32
    return %c0_i32, %c0_i32_0 : i32, i32
  }
  func.func @transform_5(%arg0: i32) -> (i32, i32, i32) {
    %c0_i32 = arith.constant 0 : i32
    %c0_i32_0 = arith.constant 0 : i32
    %c0_i32_1 = arith.constant 0 : i32
    return %arg0, %c0_i32, %c0_i32_0 : i32, i32, i32
  }
  func.func @transform_6(%arg0: i32) -> (i32, i32, i32) {
    %c0_i32 = arith.constant 0 : i32
    %c0_i32_0 = arith.constant 0 : i32
    %c0_i32_1 = arith.constant 0 : i32
    return %arg0, %c0_i32, %c0_i32_0 : i32, i32, i32
  }
  func.func @transform_7(%arg0: i32) -> (i32, i32, i32) {
    %c0_i32 = arith.constant 0 : i32
    %c0_i32_0 = arith.constant 0 : i32
    %c0_i32_1 = arith.constant 0 : i32
    return %arg0, %c0_i32, %c0_i32_0 : i32, i32, i32
  }
  func.func @transform_8(%arg0: i32) -> (i32, i32, i32) {
    %c0_i32 = arith.constant 0 : i32
    %c0_i32_0 = arith.constant 0 : i32
    %c0_i32_1 = arith.constant 0 : i32
    return %arg0, %c0_i32, %c0_i32_0 : i32, i32, i32
  }
  func.func @transform_9(%arg0: i32) -> (i32, i32, i32) {
    %c0_i32 = arith.constant 0 : i32
    %c0_i32_0 = arith.constant 0 : i32
    %c0_i32_1 = arith.constant 0 : i32
    return %arg0, %c0_i32, %c0_i32_0 : i32, i32, i32
  }
  func.func @transform_10(%arg0: i32) -> (i32, i32, i32) {
    %c0_i32 = arith.constant 0 : i32
    %c0_i32_0 = arith.constant 0 : i32
    %c0_i32_1 = arith.constant 0 : i32
    return %arg0, %c0_i32, %c0_i32_0 : i32, i32, i32
  }
  func.func @transform_11(%arg0: i32) -> (i32, i32, i32) {
    %c0_i32 = arith.constant 0 : i32
    %c0_i32_0 = arith.constant 0 : i32
    %c0_i32_1 = arith.constant 0 : i32
    return %arg0, %c0_i32, %c0_i32_0 : i32, i32, i32
  }
  func.func @transform_12(%arg0: i32) -> (i32, i32, i32) {
    %c0_i32 = arith.constant 0 : i32
    %c0_i32_0 = arith.constant 0 : i32
    %c0_i32_1 = arith.constant 0 : i32
    return %arg0, %c0_i32, %c0_i32_0 : i32, i32, i32
  }
  func.func @transform_13(%arg0: i32) -> (i32, i32, i32) {
    %c0_i32 = arith.constant 0 : i32
    %c0_i32_0 = arith.constant 0 : i32
    %c0_i32_1 = arith.constant 0 : i32
    return %arg0, %c0_i32, %c0_i32_0 : i32, i32, i32
  }
  func.func @transform_14(%arg0: i32) -> (i32, i32, i32) {
    %c0_i32 = arith.constant 0 : i32
    %c0_i32_0 = arith.constant 0 : i32
    %c0_i32_1 = arith.constant 0 : i32
    return %arg0, %c0_i32, %c0_i32_0 : i32, i32, i32
  }
  func.func @transform_15(%arg0: i32) -> (i32, i32, i32) {
    %c0_i32 = arith.constant 0 : i32
    %c0_i32_0 = arith.constant 0 : i32
    %c0_i32_1 = arith.constant 0 : i32
    return %arg0, %c0_i32, %c0_i32_0 : i32, i32, i32
  }
  func.func @transform_16(%arg0: i32) -> (i32, i32, i32) {
    %c0_i32 = arith.constant 0 : i32
    %c0_i32_0 = arith.constant 0 : i32
    %c0_i32_1 = arith.constant 0 : i32
    return %arg0, %c0_i32, %c0_i32_0 : i32, i32, i32
  }
  func.func @transform_17(%arg0: i32) -> (i32, i32) {
    %c0_i32 = arith.constant 0 : i32
    %c0_i32_0 = arith.constant 0 : i32
    %c0_i32_1 = arith.constant 0 : i32
    return %c0_i32, %c0_i32_0 : i32, i32
  }
  func.func @transform_18(%arg0: i32) -> (i32, i32) {
    %c0_i32 = arith.constant 0 : i32
    %c0_i32_0 = arith.constant 0 : i32
    %c0_i32_1 = arith.constant 0 : i32
    return %c0_i32, %c0_i32_0 : i32, i32
  }
  func.func @transform_19(%arg0: i32) -> (i32, i32) {
    %c0_i32 = arith.constant 0 : i32
    %c0_i32_0 = arith.constant 0 : i32
    %c0_i32_1 = arith.constant 0 : i32
    return %c0_i32, %c0_i32_0 : i32, i32
  }
  func.func @transform_20(%arg0: i32) -> (i32, i32) {
    %c0_i32 = arith.constant 0 : i32
    %c0_i32_0 = arith.constant 0 : i32
    %c0_i32_1 = arith.constant 0 : i32
    return %c0_i32, %c0_i32_0 : i32, i32
  }
  func.func @transform_21(%arg0: i32) -> (i32, i32) {
    %c0_i32 = arith.constant 0 : i32
    %c0_i32_0 = arith.constant 0 : i32
    %c0_i32_1 = arith.constant 0 : i32
    return %c0_i32, %c0_i32_0 : i32, i32
  }
}

</mosaic_0001>

<bundles_post_ra>
// kernel: transformer_forward.1
= control target key start
LH: loop header
LB: loop body
LE: loop exit
PB: predicated region body
PF: predicated region fallthrough
CT: control target
= control target key end

     0   :  { %s3216_s26 = smov 0   ;;  %s3987_s0 = inlined_call_operand.vmem [shape: f32[8,768], index: 0, kind: input, shape index: {}]   ;;  %s3988_s1 = inlined_call_operand.vmem [shape: f32[768,128], index: 1, kind: input, shape index: {}]   ;;  %s3989_s2 = inlined_call_operand.vmem [shape: f32[1,128], index: 2, kind: input, shape index: {}]   ;;  %s3990_s3 = inlined_call_operand.vmem [shape: f32[1,128], index: 3, kind: input, shape index: {}]   ;;  %s3991_s4 = inlined_call_operand.vmem [shape: f32[4,128], index: 4, kind: input, shape index: {}]   ;;  %s3992_s5 = inlined_call_operand.vmem [shape: f32[2,1,128], index: 5, kind: input, shape index: {}]   ;;  %s3993_s6 = inlined_call_operand.vmem [shape: f32[2,1,128], index: 6, kind: input, shape index: {}]   ;;  %s3994_s7 = inlined_call_operand.vmem [shape: bf16[2,128,384], index: 7, kind: input, shape index: {}]   ;;  %s3995_s8 = inlined_call_operand.vmem [shape: f32[2,1,384], index: 8, kind: input, shape index: {}]   ;;  %s3996_s9 = inlined_call_operand.vmem [shape: bf16[2,128,128], index: 9, kind: input, shape index: {}]   ;;  %s3997_s10 = inlined_call_operand.vmem [shape: f32[2,1,128], index: 10, kind: input, shape index: {}]   ;;  %s3998_s11 = inlined_call_operand.vmem [shape: f32[2,1,128], index: 11, kind: input, shape index: {}]   ;;  %s3999_s12 = inlined_call_operand.vmem [shape: f32[2,1,128], index: 12, kind: input, shape index: {}]   ;;  %s4000_s13 = inlined_call_operand.vmem [shape: bf16[2,128,256], index: 13, kind: input, shape index: {}]   ;;  %s4001_s14 = inlined_call_operand.vmem [shape: f32[2,1,256], index: 14, kind: input, shape index: {}]   ;;  %s4002_s15 = inlined_call_operand.vmem [shape: bf16[2,256,128], index: 15, kind: input, shape index: {}]   ;;  %s4003_s16 = inlined_call_operand.vmem [shape: f32[2,1,128], index: 16, kind: input, shape index: {}]   ;;  %s4004_s17 = inlined_call_operand.vmem [shape: f32[1,128], index: 17, kind: input, shape index: {}]   ;;  %s4005_s18 = inlined_call_operand.vmem [shape: f32[1,128], index: 18, kind: input, shape index: {}]   ;;  %s4006_s19 = inlined_call_operand.vmem [shape: f32[128,1], index: 19, kind: input, shape index: {}]   ;;  %s4007_s20 = inlined_call_operand.<no memory space> [shape: f32[1,1], index: 20, kind: input, shape index: {}]   ;;  %s4008_s21 = inlined_call_operand.vmem [shape: f32[2,1], index: 21, kind: output, shape index: {}]  }
   0x1   :  { %4013 = sst [smem:[#allocation5_spill]] %s3987_s0  ;;  %v26_v0 = vstv %s4007_s20 }
   0x2   :  { %4014 = sst [smem:[#allocation6_spill]] %s3988_s1  ;;  %27 = vst [vmem:[#allocation3] sm:$0x1] %v26_v0 }
   0x3   :  { %4015 = sst [smem:[#allocation7_spill]] %s3989_s2 }
   0x4   :  { %4016 = sst [smem:[#allocation8_spill]] %s3990_s3 }
   0x5   :  { %4017 = sst [smem:[#allocation9_spill]] %s3991_s4 }
   0x6   :  { %4018 = sst [smem:[#allocation10_spill]] %s3992_s5 }
   0x7   :  { %4019 = sst [smem:[#allocation11_spill]] %s3994_s7 }
   0x8   :  { %4020 = sst [smem:[#allocation12_spill]] %s3996_s9 }
   0x9   :  { %4021 = sst [smem:[#allocation13_spill]] %s4004_s17 }
   0xa   :  { %4022 = sst [smem:[#allocation14_spill]] %s4005_s18 }
   0xb   :  { %4023 = sst [smem:[#allocation15_spill]] %s4008_s21 }
   0xc LB: > { %4024 = sst [smem:[#allocation4_spill]] %s3097_s26  ;;  %s3222_s27 = sadd.s32 4294967295, %s3097_s26   ;;  %s3097_s26 = sphi %s3216_s26, %s33_s26  }
   0xd   : > { %p2631_p0 = scmp.ge.s32.totalorder %s3097_s26, 1  ;;  %p680_p1 = scmp.lt.s32.totalorder %s3097_s26, 3 }
   0xf   : > { %p681_p2 = pnand %p2631_p0, %p680_p1 }
  0x10   : > { %p776_p3 = scmp.lt.s32.totalorder (!%p681_p2), %s3222_s27, 1  ;;  %s4026_s9 = sld [smem:[#allocation12_spill]] (!%p681_p2) }
  0x11   : > { %684 = sbr.rel (%p681_p2) target bundleno = 3638 (0xe36), region = 104  ;;  %s4027_s7 = sld [smem:[#allocation11_spill]] (!%p681_p2) }
  0x12   : > { %p2640_p4 = scmp.ne.s32.totalorder (!%p681_p2), %s3222_s27, 0 }
  0x16   : > { %s3228_s20 = scalar_select %p776_p3, %s3222_s27, 1 }
  0x17   : > { %s4029_s29 = sld [smem:[#allocation5_spill]] (!%p2640_p4) }
  0x18   : > { %s2999_s22 = smul.u32 192, %s3228_s20  ;;  %s2932_s23 = sshll.u32 %s3228_s20, 6 }
  0x19   : > { %s3000_s1 = smul.u32 3, %s3228_s20  ;;  %s3244_s25 = scalar_lea.vmem %s4026_s9, %s2932_s23 }
  0x1a   : > { %s3249_s26 = scalar_lea.vmem %s4027_s7, %s2999_s22  ;;  %s2933_s3 = sshll.u32 %s3228_s20, 7 }
  0x1b   : > { %s3258_s5 = scalar_lea.vmem %s3995_s8, %s3000_s1  ;;  %s3272_s7 = scalar_lea.vmem %s4000_s13, %s2933_s3 }
  0x1c   : > { %s2637_s21 = sshll.u32 %s3228_s20, 1  ;;  %s3283_s17 = scalar_lea.vmem %s4002_s15, %s2933_s3 }
  0x1d   : > { %s3278_s1 = scalar_lea.vmem %s4001_s14, %s2637_s21  ;;  %s821_s2 = scalar_lea.vmem %s4003_s16, %s3228_s20 }
  0x1e   : > { %825 = sbr.rel (%p2640_p4) target bundleno = 238 (0xee), region = 108  ;;  %s4028_s9 = sld [smem:[#allocation6_spill]] (!%p2640_p4) }
  0x1f   : > { %s4030_s0 = sld [smem:[#allocation7_spill]] (!%p2640_p4) }
  0x20   : > { %s4031_s4 = sld [smem:[#allocation9_spill]] (!%p2640_p4) }
  0x21   : > { %s4032_s23 = sld [smem:[#allocation8_spill]] (!%p2640_p4) }
  0x23   : > { %vm1068_vm0 = vcmask 1040384   ;;  %vm1070_vm1 = vcmask 1044480   ;;  %vm1072_vm2 = vcmask 1045504  }
  0x24   : > { %v847_v1 = vld [vmem:[%s4028_s9 + $0x78] sm:$0xff]  ;;  %v846_v2 = vld [vmem:[%s4028_s9 + $0x70] sm:$0xff]  ;;  %v845_v5 = vld [vmem:[%s4028_s9 + $0x68] sm:$0xff] }
  0x25   : > { %v863_v3 = vld [vmem:[%s4028_s9 + $0xf8] sm:$0xff]  ;;  %932 = vmatpush.msra.mxu0 %v847_v1  ;;  %v862_v4 = vld [vmem:[%s4028_s9 + $0xf0] sm:$0xff]  ;;  %v861_v6 = vld [vmem:[%s4028_s9 + $0xe8] sm:$0xff] }
  0x26   : > { %952 = vmatpush.msra.mxu1 %v863_v3  ;;  %v844_v7 = vld [vmem:[%s4028_s9 + $0x60] sm:$0xff]  ;;  %v843_v9 = vld [vmem:[%s4028_s9 + $0x58] sm:$0xff]  ;;  %v842_v11 = vld [vmem:[%s4028_s9 + $0x50] sm:$0xff] }
  0x27   : > { %933 = vmatpush.msra.mxu0 %v846_v2  ;;  %v860_v8 = vld [vmem:[%s4028_s9 + $0xe0] sm:$0xff]  ;;  %v859_v10 = vld [vmem:[%s4028_s9 + $0xd8] sm:$0xff]  ;;  %v858_v13 = vld [vmem:[%s4028_s9 + $0xd0] sm:$0xff] }
  0x28   : > { %953 = vmatpush.msra.mxu1 %v862_v4  ;;  %v879_v12 = vld [vmem:[%s4028_s9 + $0x178] sm:$0xff]  ;;  %v878_v14 = vld [vmem:[%s4028_s9 + $0x170] sm:$0xff]  ;;  %v877_v16 = vld [vmem:[%s4028_s9 + $0x168] sm:$0xff] }
  0x29   : > { %934 = vmatpush.msra.mxu0 %v845_v5  ;;  %972 = vmatpush.msra.mxu2 %v879_v12  ;;  %v895_v15 = vld [vmem:[%s4028_s9 + $0x1f8] sm:$0xff]  ;;  %v894_v17 = vld [vmem:[%s4028_s9 + $0x1f0] sm:$0xff]  ;;  %v841_v18 = vld [vmem:[%s4028_s9 + $0x48] sm:$0xff] }
  0x2a   : > { %954 = vmatpush.msra.mxu1 %v861_v6  ;;  %v857_v19 = vld [vmem:[%s4028_s9 + $0xc8] sm:$0xff]  ;;  %992 = vmatpush.msra.mxu3 %v895_v15  ;;  %v876_v20 = vld [vmem:[%s4028_s9 + $0x160] sm:$0xff]  ;;  %v875_v24 = vld [vmem:[%s4028_s9 + $0x158] sm:$0xff] }
  0x2b   : > { %935 = vmatpush.msra.mxu0 %v844_v7  ;;  %973 = vmatpush.msra.mxu2 %v878_v14  ;;  %v893_v21 = vld [vmem:[%s4028_s9 + $0x1e8] sm:$0xff]  ;;  %v840_v22 = vld [vmem:[%s4028_s9 + $0x40] sm:$0xff]  ;;  %v839_v26 = vld [vmem:[%s4028_s9 + $0x38] sm:$0xff] }
  0x2c   : > { %955 = vmatpush.msra.mxu1 %v860_v8  ;;  %v856_v23 = vld [vmem:[%s4028_s9 + $0xc0] sm:$0xff]  ;;  %993 = vmatpush.msra.mxu3 %v894_v17  ;;  %v855_v27 = vld [vmem:[%s4028_s9 + $0xb8] sm:$0xff]  ;;  %v874_v28 = vld [vmem:[%s4028_s9 + $0x150] sm:$0xff] }
  0x2d   : > { %936 = vmatpush.msra.mxu0 %v843_v9  ;;  %974 = vmatpush.msra.mxu2 %v877_v16  ;;  %v892_v25 = vld [vmem:[%s4028_s9 + $0x1e0] sm:$0xff]  ;;  %v891_v29 = vld [vmem:[%s4028_s9 + $0x1d8] sm:$0xff]  ;;  %v838_v30 = vld [vmem:[%s4028_s9 + $0x30] sm:$0xff] }
  0x2e   : > { %956 = vmatpush.msra.mxu1 %v859_v10  ;;  %994 = vmatpush.msra.mxu3 %v893_v21  ;;  %v854_v31 = vld [vmem:[%s4028_s9 + $0xb0] sm:$0xff]  ;;  %v873_v32 = vld [vmem:[%s4028_s9 + $0x148] sm:$0xff]  ;;  %v872_v36 = vld [vmem:[%s4028_s9 + $0x140] sm:$0xff] }
  0x2f   : > { %937 = vmatpush.msra.mxu0 %v842_v11  ;;  %975 = vmatpush.msra.mxu2 %v876_v20  ;;  %v890_v33 = vld [vmem:[%s4028_s9 + $0x1d0] sm:$0xff]  ;;  %v837_v34 = vld [vmem:[%s4028_s9 + $0x28] sm:$0xff]  ;;  %v836_v38 = vld [vmem:[%s4028_s9 + $0x20] sm:$0xff] }
  0x30   : > { %957 = vmatpush.msra.mxu1 %v858_v13  ;;  %995 = vmatpush.msra.mxu3 %v892_v25  ;;  %v853_v35 = vld [vmem:[%s4028_s9 + $0xa8] sm:$0xff]  ;;  %v852_v39 = vld [vmem:[%s4028_s9 + $0xa0] sm:$0xff]  ;;  %v871_v40 = vld [vmem:[%s4028_s9 + $0x138] sm:$0xff] }
  0x31   : > { %938 = vmatpush.msra.mxu0 %v841_v18  ;;  %976 = vmatpush.msra.mxu2 %v875_v24  ;;  %v889_v37 = vld [vmem:[%s4028_s9 + $0x1c8] sm:$0xff]  ;;  %v888_v41 = vld [vmem:[%s4028_s9 + $0x1c0] sm:$0xff]  ;;  %v835_v42 = vld [vmem:[%s4028_s9 + $0x18] sm:$0xff] }
  0x32   : > { %958 = vmatpush.msra.mxu1 %v857_v19  ;;  %996 = vmatpush.msra.mxu3 %v891_v29  ;;  %v851_v43 = vld [vmem:[%s4028_s9 + $0x98] sm:$0xff]  ;;  %v870_v44 = vld [vmem:[%s4028_s9 + $0x130] sm:$0xff]  ;;  %v869_v48 = vld [vmem:[%s4028_s9 + $0x128] sm:$0xff] }
  0x33   : > { %939 = vmatpush.msra.mxu0 %v840_v22  ;;  %977 = vmatpush.msra.mxu2 %v874_v28  ;;  %v887_v45 = vld [vmem:[%s4028_s9 + $0x1b8] sm:$0xff]  ;;  %v834_v46 = vld [vmem:[%s4028_s9 + $0x10] sm:$0xff]  ;;  %v833_v50 = vld [vmem:[%s4028_s9 + $0x8] sm:$0xff] }
  0x34   : > { %959 = vmatpush.msra.mxu1 %v856_v23  ;;  %997 = vmatpush.msra.mxu3 %v890_v33  ;;  %v850_v47 = vld [vmem:[%s4028_s9 + $0x90] sm:$0xff]  ;;  %v849_v51 = vld [vmem:[%s4028_s9 + $0x88] sm:$0xff]  ;;  %v868_v52 = vld [vmem:[%s4028_s9 + $0x120] sm:$0xff] }
  0x35   : > { %940 = vmatpush.msra.mxu0 %v839_v26  ;;  %978 = vmatpush.msra.mxu2 %v873_v32  ;;  %v886_v49 = vld [vmem:[%s4028_s9 + $0x1b0] sm:$0xff]  ;;  %v885_v53 = vld [vmem:[%s4028_s9 + $0x1a8] sm:$0xff]  ;;  %v832_v54 = vld [vmem:[%s4028_s9] sm:$0xff] }
  0x36   : > { %960 = vmatpush.msra.mxu1 %v855_v27  ;;  %998 = vmatpush.msra.mxu3 %v889_v37  ;;  %v848_v55 = vld [vmem:[%s4028_s9 + $0x80] sm:$0xff]  ;;  %v911_v56 = vld [vmem:[%s4028_s9 + $0x278] sm:$0xff]  ;;  %v910_v60 = vld [vmem:[%s4028_s9 + $0x270] sm:$0xff] }
  0x37   : > { %941 = vmatpush.msra.mxu0 %v838_v30  ;;  %979 = vmatpush.msra.mxu2 %v872_v36  ;;  %v927_v57 = vld [vmem:[%s4028_s9 + $0x2f8] sm:$0xff]  ;;  %v884_v59 = vld [vmem:[%s4028_s9 + $0x1a0] sm:$0xff]  ;;  %v926_v61 = vld [vmem:[%s4028_s9 + $0x2f0] sm:$0xff] }
  0x38   : > { %961 = vmatpush.msra.mxu1 %v854_v31  ;;  %999 = vmatpush.msra.mxu3 %v888_v41  ;;  %v867_v58 = vld [vmem:[%s4028_s9 + $0x118] sm:$0xff]  ;;  %v866_v62 = vld [vmem:[%s4028_s9 + $0x110] sm:$0xff]  ;;  %v909_v0 = vld [vmem:[%s4028_s9 + $0x268] sm:$0xff] }
  0x39   : > { %942 = vmatpush.msra.mxu0 %v837_v34  ;;  %980 = vmatpush.msra.mxu2 %v871_v40  ;;  %v883_v63 = vld [vmem:[%s4028_s9 + $0x198] sm:$0xff]  ;;  %v925_v1 = vld [vmem:[%s4028_s9 + $0x2e8] sm:$0xff]  ;;  %v882_v3 = vld [vmem:[%s4028_s9 + $0x190] sm:$0xff] }
  0x3a   : > { %962 = vmatpush.msra.mxu1 %v853_v35  ;;  %1000 = vmatpush.msra.mxu3 %v887_v45  ;;  %v865_v2 = vld [vmem:[%s4028_s9 + $0x108] sm:$0xff]  ;;  %v908_v4 = vld [vmem:[%s4028_s9 + $0x260] sm:$0xff]  ;;  %v907_v8 = vld [vmem:[%s4028_s9 + $0x258] sm:$0xff] }
  0x3b   : > { %943 = vmatpush.msra.mxu0 %v836_v38  ;;  %981 = vmatpush.msra.mxu2 %v870_v44  ;;  %v924_v5 = vld [vmem:[%s4028_s9 + $0x2e0] sm:$0xff]  ;;  %v881_v7 = vld [vmem:[%s4028_s9 + $0x188] sm:$0xff]  ;;  %v923_v9 = vld [vmem:[%s4028_s9 + $0x2d8] sm:$0xff] }
  0x3c   : > { %963 = vmatpush.msra.mxu1 %v852_v39  ;;  %1001 = vmatpush.msra.mxu3 %v886_v49  ;;  %v864_v6 = vld [vmem:[%s4028_s9 + $0x100] sm:$0xff]  ;;  %v828_v10 = vld [vmem:[%s4029_s29 + $0x10] sm:$0xff]  ;;  %v829_v15 = vld [vmem:[%s4029_s29 + $0x18] sm:$0xff] }
  0x3d   : > { %944 = vmatpush.msra.mxu0 %v835_v42  ;;  %982 = vmatpush.msra.mxu2 %v869_v48  ;;  %v880_v11 = vld [vmem:[%s4028_s9 + $0x180] sm:$0xff]  ;;  %v906_v12 = vld [vmem:[%s4028_s9 + $0x250] sm:$0xff]  ;;  %v905_v16 = vld [vmem:[%s4028_s9 + $0x248] sm:$0xff] }
  0x3e   : > { %964 = vmatpush.msra.mxu1 %v851_v43  ;;  %1002 = vmatpush.msra.mxu3 %v885_v53  ;;  %v922_v13 = vld [vmem:[%s4028_s9 + $0x2d0] sm:$0xff]  ;;  %v826_v14 = vld [vmem:[%s4029_s29] sm:$0xff]  ;;  %v921_v17 = vld [vmem:[%s4028_s9 + $0x2c8] sm:$0xff] }
  0x3f   : > { %945 = vmatpush.msra.mxu0 %v834_v46  ;;  %983 = vmatpush.msra.mxu2 %v868_v52  ;;  %v827_v18 = vld [vmem:[%s4029_s29 + $0x8] sm:$0xff]  ;;  %v904_v19 = vld [vmem:[%s4028_s9 + $0x240] sm:$0xff]  ;;  %v903_v21 = vld [vmem:[%s4028_s9 + $0x238] sm:$0xff] }
  0x40   : > { %965 = vmatpush.msra.mxu1 %v850_v47  ;;  %1003 = vmatpush.msra.mxu3 %v884_v59  ;;  %v920_v20 = vld [vmem:[%s4028_s9 + $0x2c0] sm:$0xff]  ;;  %v919_v22 = vld [vmem:[%s4028_s9 + $0x2b8] sm:$0xff]  ;;  %v902_v23 = vld [vmem:[%s4028_s9 + $0x230] sm:$0xff] }
  0x41   : > { %946 = vmatpush.msra.mxu0 %v833_v50  ;;  %984 = vmatpush.msra.mxu2 %v867_v58  ;;  %v918_v24 = vld [vmem:[%s4028_s9 + $0x2b0] sm:$0xff]  ;;  %v901_v25 = vld [vmem:[%s4028_s9 + $0x228] sm:$0xff]  ;;  %v900_v27 = vld [vmem:[%s4028_s9 + $0x220] sm:$0xff] }
  0x42   : > { %966 = vmatpush.msra.mxu1 %v849_v51  ;;  %1004 = vmatpush.msra.mxu3 %v883_v63  ;;  %v917_v26 = vld [vmem:[%s4028_s9 + $0x2a8] sm:$0xff]  ;;  %v916_v28 = vld [vmem:[%s4028_s9 + $0x2a0] sm:$0xff]  ;;  %v899_v29 = vld [vmem:[%s4028_s9 + $0x218] sm:$0xff] }
  0x43   : > { %947 = vmatpush.msra.mxu0 %v832_v54  ;;  %985 = vmatpush.msra.mxu2 %v866_v62  ;;  %v915_v30 = vld [vmem:[%s4028_s9 + $0x298] sm:$0xff]  ;;  %v898_v31 = vld [vmem:[%s4028_s9 + $0x210] sm:$0xff]  ;;  %v897_v33 = vld [vmem:[%s4028_s9 + $0x208] sm:$0xff] }
  0x44   : > { %967 = vmatpush.msra.mxu1 %v848_v55  ;;  %1005 = vmatpush.msra.mxu3 %v882_v3  ;;  %v914_v32 = vld [vmem:[%s4028_s9 + $0x290] sm:$0xff]  ;;  %v913_v34 = vld [vmem:[%s4028_s9 + $0x288] sm:$0xff]  ;;  %v896_v35 = vld [vmem:[%s4028_s9 + $0x200] sm:$0xff] }
  0x45   : > { %1012 = vmatpush.msrb.mxu0 %v911_v56  ;;  %986 = vmatpush.msra.mxu2 %v865_v2  ;;  %v912_v36 = vld [vmem:[%s4028_s9 + $0x280] sm:$0xff]  ;;  %v831_v38 = vld [vmem:[%s4029_s29 + $0x28] sm:$0xff] }
  0x46   : > { %1032 = vmatpush.msrb.mxu1 %v927_v57  ;;  %1006 = vmatpush.msra.mxu3 %v881_v7  ;;  %v830_v37 = vld [vmem:[%s4029_s29 + $0x20] sm:$0xff] }
  0x47   : > { %1013 = vmatpush.msrb.mxu0 %v910_v60  ;;  %987 = vmatpush.msra.mxu2 %v864_v6  ;;  %v3013_v39 = vld [vmem:[%s4030_s0] ss:$0 sm:$0xff] }
  0x48   : > { %1033 = vmatpush.msrb.mxu1 %v926_v61  ;;  %988 = vmatmul.f32.vlgmr.msra.gmra.mxu2 %v828_v10  ;;  %v1053_v48 = vld [vmem:[%s4031_s4] sm:$0xf] }
  0x49   : > { %1014 = vmatpush.msrb.mxu0 %v909_v0  ;;  %1007 = vmatpush.msra.mxu3 %v880_v11  ;;  %v1056_v52 = vrot.slane %v1053_v48, 4  ;;  %v1052_v56 = vld [vmem:[%s4032_s23] sm:$0x1] }
  0x4a   : > { %1034 = vmatpush.msrb.mxu1 %v925_v1  ;;  %948 = vmatmul.f32.vlgmr.msra.gmra.mxu0 %v826_v14  ;;  %v3014_v57 = vld [vmem:[%s4032_s23] ss:$0 sm:$0xff] }
  0x4b   : > { %1015 = vmatpush.msrb.mxu0 %v908_v4  ;;  %1008 = vmatmul.f32.vlgmr.msra.gmra.mxu3 %v829_v15 }
  0x4c   : > { %1035 = vmatpush.msrb.mxu1 %v924_v5 }
  0x4d   : > { %1016 = vmatpush.msrb.mxu0 %v907_v8  ;;  %968 = vmatmul.f32.vlgmr.msra.gmra.mxu1 %v827_v18 }
  0x4e   : > { %1036 = vmatpush.msrb.mxu1 %v923_v9 }
  0x4f   : > { %1017 = vmatpush.msrb.mxu0 %v906_v12 }
  0x50   : > { %1037 = vmatpush.msrb.mxu1 %v922_v13 }
  0x51   : > { %1018 = vmatpush.msrb.mxu0 %v905_v16 }
  0x52   : > { %1038 = vmatpush.msrb.mxu1 %v921_v17 }
  0x53   : > { %1019 = vmatpush.msrb.mxu0 %v904_v19 }
  0x54   : > { %1039 = vmatpush.msrb.mxu1 %v920_v20 }
  0x55   : > { %1020 = vmatpush.msrb.mxu0 %v903_v21 }
  0x56   : > { %1040 = vmatpush.msrb.mxu1 %v919_v22 }
  0x57   : > { %1021 = vmatpush.msrb.mxu0 %v902_v23 }
  0x58   : > { %1041 = vmatpush.msrb.mxu1 %v918_v24 }
  0x59   : > { %1022 = vmatpush.msrb.mxu0 %v901_v25 }
  0x5a   : > { %1042 = vmatpush.msrb.mxu1 %v917_v26 }
  0x5b   : > { %1023 = vmatpush.msrb.mxu0 %v900_v27 }
  0x5c   : > { %1043 = vmatpush.msrb.mxu1 %v916_v28 }
  0x5d   : > { %1024 = vmatpush.msrb.mxu0 %v899_v29 }
  0x5e   : > { %1044 = vmatpush.msrb.mxu1 %v915_v30 }
  0x5f   : > { %1025 = vmatpush.msrb.mxu0 %v898_v31 }
  0x60   : > { %1045 = vmatpush.msrb.mxu1 %v914_v32 }
  0x61   : > { %1026 = vmatpush.msrb.mxu0 %v897_v33 }
  0x62   : > { %1046 = vmatpush.msrb.mxu1 %v913_v34 }
  0x63   : > { %1027 = vmatpush.msrb.mxu0 %v896_v35 }
  0x64   : > { %1047 = vmatpush.msrb.mxu1 %v912_v36  ;;  %1028 = vmatmul.f32.vlgmr.msrb.gmra.mxu0 %v830_v37 }
  0x65   : > { %1048 = vmatmul.f32.vlgmr.msrb.gmra.mxu1 %v831_v38 }
  0xc7   : > { %v949_v40 = vpop.f32.mrf.mxu0 }
  0xc8   : > { %v950_v41 = vadd.f32 %v3013_v39, %v949_v40 }
  0xca   : > { %v969_v42 = vpop.f32.mrf.mxu1 }
  0xcb   : > { %v970_v43 = vadd.f32 %v969_v42, %v950_v41  ;;  %v989_v44 = vpop.f32.mrf.mxu2 }
  0xcd   : > { %v990_v45 = vadd.f32 %v989_v44, %v970_v43 }
  0xce   : > { %v1009_v46 = vpop.f32.mrf.mxu3 }
  0xcf   : > { %v1010_v47 = vadd.f32 %v1009_v46, %v990_v45 }
  0xe1   : > { %v1029_v49 = vpop.f32.mrf.mxu0 }
  0xe2   : > { %v1049_v50 = vpop.f32.mrf.mxu1  ;;  %v1030_v51 = vadd.f32 %v1029_v49, %v1010_v47 }
  0xe4   : > { %v1050_v53 = vadd.f32 %v1049_v50, %v1030_v51 }
  0xe6   : > { %v1054_v54 = vadd.f32 %v1053_v48, %v1050_v53  ;;  %v1058_v55 = vadd.f32 %v1056_v52, %v1050_v53 }
  0xe8   : > { %v1060_v58 = vrot.slane %v1054_v54, 7  ;;  %v1066_v59 = vrot.slane %v1058_v55, 6 }
  0xea   : > { %v1069_v60 = vsel %vm1068_vm0, %v1052_v56, %v1060_v58  ;;  %1075 = vst [vmem:[#allocation2 + $0x8] sm:$0x3] %v1066_v59 }
  0xeb   : > { %v1071_v61 = vsel %vm1070_vm1, %v1069_v60, %v3014_v57 }
  0xec   : > { %v1073_v62 = vsel %vm1072_vm2, %v1071_v61, %v1066_v59 }
  0xed   : > { %1074 = vst [vmem:[#allocation2] sm:$0xff] %v1073_v62 }
  0xee PF: > { %vm1082_vm3 = vcmask 1041408   ;;  %v3099_v2 = vmov 128.0   ;;  %v2727_v18 = vld [vmem:[%s3249_s26 + $0xa8] sm:$0xf]  ;;  %v2957_v19 = vld [vmem:[%s3249_s26 + $0xb0] sm:$0xf0]  ;;  %s4035_s30 = scalar_lea.vmem %s3993_s6, %s3228_s20  ;;  %s4038_s4 = scalar_lea.vmem %s3999_s12, %s3228_s20 }
  0xef   : > { %3036 = vrcp.f32 %v3099_v2  ;;  %v2956_v20 = vld [vmem:[%s3249_s26 + $0xac] sm:$0xf]  ;;  %v2728_v21 = vor.u32 %v2957_v19, %v2727_v18  ;;  %v2729_v22 = vld [vmem:[%s3249_s26 + $0xb4] sm:$0xf0]  ;;  %v2735_v23 = vld [vmem:[%s3249_s26 + $0xb0] sm:$0xf] }
  0xf0   : > { %v2958_v24 = vld [vmem:[%s3249_s26 + $0xb8] sm:$0xf0]  ;;  %v2732_v25 = vor.u32 %v2956_v20, %v2729_v22  ;;  %v2715_v27 = vld [vmem:[%s3249_s26 + $0x90] sm:$0xf]  ;;  %v2953_v29 = vld [vmem:[%s3249_s26 + $0x94] sm:$0xf] }
  0xf1   : > { %v3608_v63 = vld [vmem:[#allocation2 + $0x8] sm:$0x3]  ;;  %v2736_v26 = vor.u32 %v2958_v24, %v2735_v23  ;;  %1309 = vmatpush.bf16.msra.mxu0 %v2728_v21  ;;  %v2954_v28 = vld [vmem:[%s3249_s26 + $0x98] sm:$0xf0]  ;;  %v2717_v31 = vld [vmem:[%s3249_s26 + $0x9c] sm:$0xf0] }
  0xf2   : > { %v1083_v0 = vsel %vm1082_vm3, %v3608_v63, 0.0  ;;  %1323 = vmatpush.bf16.msra.mxu1 %v2732_v25  ;;  %v2716_v30 = vor.u32 %v2954_v28, %v2715_v27  ;;  %v2723_v32 = vld [vmem:[%s3249_s26 + $0x98] sm:$0xf]  ;;  %v2955_v33 = vld [vmem:[%s3249_s26 + $0xa0] sm:$0xf0]  ;;  %v2720_v34 = vor.u32 %v2953_v29, %v2717_v31  ;;  %s4033_s0 = sld [smem:[#allocation10_spill]] }
  0xf3   : > { %1084 = vadd.xlane.f32.xlu0 %v1083_v0  ;;  %1337 = vmatpush.bf16.msra.mxu2 %v2736_v26  ;;  %v2724_v35 = vor.u32 %v2955_v33, %v2723_v32  ;;  %v2703_v36 = vld [vmem:[%s3249_s26 + $0x78] sm:$0xf]  ;;  %v2951_v37 = vld [vmem:[%s3249_s26 + $0x80] sm:$0xf0]  ;;  %v2950_v38 = vld [vmem:[%s3249_s26 + $0x7c] sm:$0xf] }
  0xf4   : > { %v3612_v1 = vld [vmem:[#allocation2] sm:$0xff]  ;;  %v2704_v39 = vor.u32 %v2951_v37, %v2703_v36  ;;  %v2705_v40 = vld [vmem:[%s3249_s26 + $0x84] sm:$0xf0]  ;;  %v2952_v42 = vld [vmem:[%s3249_s26 + $0x88] sm:$0xf0]  ;;  %vm1351_vm11 = vcmask 261120  }
  0xf5   : > { %v3037_v3 = vpop.eup %3036  ;;  %1310 = vmatpush.bf16.msra.mxu0 %v2716_v30  ;;  %v2711_v41 = vld [vmem:[%s3249_s26 + $0x80] sm:$0xf]  ;;  %v2708_v43 = vor.u32 %v2950_v38, %v2705_v40  ;;  %v2948_v46 = vld [vmem:[%s3249_s26 + $0x68] sm:$0xf0]  ;;  %v2947_v47 = vld [vmem:[%s3249_s26 + $0x64] sm:$0xf] }
  0xf6   : > { %v1087_v4 = vmul.f32 128.0, %v3037_v3  ;;  %vm1091_vm4 = vweird.f32 %v3037_v3  ;;  %1324 = vmatpush.bf16.msra.mxu1 %v2720_v34  ;;  %v2712_v44 = vor.u32 %v2952_v42, %v2711_v41  ;;  %v2691_v45 = vld [vmem:[%s3249_s26 + $0x60] sm:$0xf]  ;;  %v2693_v49 = vld [vmem:[%s3249_s26 + $0x6c] sm:$0xf0]  ;;  %s3100_s18 = smov 96  }
  0xf7   : > { %1338 = vmatpush.bf16.msra.mxu2 %v2724_v35  ;;  %v2692_v48 = vor.u32 %v2948_v46, %v2691_v45  ;;  %v2699_v50 = vld [vmem:[%s3249_s26 + $0x68] sm:$0xf]  ;;  %v2949_v51 = vld [vmem:[%s3249_s26 + $0x70] sm:$0xf0]  ;;  %v2696_v52 = vor.u32 %v2947_v47, %v2693_v49  ;;  %v2944_v56 = vld [vmem:[%s3249_s26 + $0x4c] sm:$0xf] }
  0xf8   : > { %v1088_v5 = vsub.f32 1.0, %v1087_v4  ;;  %v2700_v53 = vor.u32 %v2949_v51, %v2699_v50  ;;  %v2679_v54 = vld [vmem:[%s3249_s26 + $0x48] sm:$0xf]  ;;  %v2945_v55 = vld [vmem:[%s3249_s26 + $0x50] sm:$0xf0]  ;;  %s4034_s21 = scalar_lea.vmem %s4033_s0, %s3228_s20  ;;  %vm1395_vm12 = vcmask 1044480   ;;  %s4037_s0 = scalar_lea.vmem %s3998_s11, %s3228_s20 }
  0xf9   : > { %1311 = vmatpush.bf16.msra.mxu0 %v2704_v39  ;;  %v2680_v57 = vor.u32 %v2945_v55, %v2679_v54  ;;  %v2681_v58 = vld [vmem:[%s3249_s26 + $0x54] sm:$0xf0]  ;;  %v2687_v59 = vld [vmem:[%s3249_s26 + $0x50] sm:$0xf]  ;;  %v2946_v60 = vld [vmem:[%s3249_s26 + $0x58] sm:$0xf0] }
  0xfa   : > { %v1089_v6 = vmul.f32 %v3037_v3, %v1088_v5  ;;  %1325 = vmatpush.bf16.msra.mxu1 %v2708_v43  ;;  %v2684_v61 = vor.u32 %v2944_v56, %v2681_v58  ;;  %v2688_v62 = vor.u32 %v2946_v60, %v2687_v59  ;;  %v2667_v0 = vld [vmem:[%s3249_s26 + $0x30] sm:$0xf]  ;;  %v2942_v2 = vld [vmem:[%s3249_s26 + $0x38] sm:$0xf0]  ;;  %v2669_v5 = vld [vmem:[%s3249_s26 + $0x3c] sm:$0xf0] }
  0xfb   : > { %1080 = vadd.xlane.f32.xlu0 %v3612_v1  ;;  %1339 = vmatpush.bf16.msra.mxu2 %v2712_v44  ;;  %v2668_v4 = vor.u32 %v2942_v2, %v2667_v0  ;;  %v2663_v18 = vld [vmem:[%s3249_s26 + $0x20] sm:$0xf]  ;;  %v2940_v19 = vld [vmem:[%s3249_s26 + $0x28] sm:$0xf0]  ;;  %v2935_v24 = vld [vmem:[%s3249_s26 + $0x4] sm:$0xf] }
  0xfc   : > { %v1090_v8 = vadd.f32 %v3037_v3, %v1089_v6  ;;  %v2675_v6 = vld [vmem:[%s3249_s26 + $0x38] sm:$0xf]  ;;  %v2664_v21 = vor.u32 %v2940_v19, %v2663_v18  ;;  %v2643_v22 = vld [vmem:[%s3249_s26] sm:$0xf]  ;;  %v2936_v23 = vld [vmem:[%s3249_s26 + $0x8] sm:$0xf0] }
  0xfd   : > { %1312 = vmatpush.bf16.msra.mxu0 %v2692_v48  ;;  %v2644_v26 = vor.u32 %v2936_v23, %v2643_v22  ;;  %v2645_v27 = vld [vmem:[%s3249_s26 + $0xc] sm:$0xf0]  ;;  %v2651_v28 = vld [vmem:[%s3249_s26 + $0x8] sm:$0xf]  ;;  %v2937_v29 = vld [vmem:[%s3249_s26 + $0x10] sm:$0xf0] }
  0xfe   : > { %v3615_v9 = vsel %vm1091_vm4, %v3037_v3, %v1090_v8  ;;  %1326 = vmatpush.bf16.msra.mxu1 %v2696_v52  ;;  %v2941_v3 = vld [vmem:[%s3249_s26 + $0x34] sm:$0xf]  ;;  %v2648_v31 = vor.u32 %v2935_v24, %v2645_v27  ;;  %v2652_v32 = vor.u32 %v2937_v29, %v2651_v28  ;;  %v3030_v50 = vld [vmem:[%s4034_s21] ss:$0 sm:$0xff]  ;;  %vm1638_vm13 = vcmask 1042432   ;;  %s3102_s22 = smov 32  }
  0xff   : > { %1340 = vmatpush.bf16.msra.mxu2 %v2700_v53  ;;  %v2672_v8 = vor.u32 %v2941_v3, %v2669_v5  ;;  %v3031_v55 = vld [vmem:[%s4035_s30] ss:$0 sm:$0xff]  ;;  %vm1379_vm14 = vcmask 36864   ;;  %vm1391_vm15 = vcmask 39936   ;;  %vm1633_vm0 = vcmask 523264   ;;  %p2929_p5 = scmp.ne.s32.totalorder %s3222_s27, 1 }
 0x100   : > { %v3693_v59 = vld [vmem:[%s3258_s5] sm:$0x7]  ;;  %s3101_s5 = smov 64   ;;  %vm1635_vm1 = vcmask 785408   ;;  %s4041_s27 = sld [smem:[#allocation15_spill]] (!%p2929_p5) }
 0x101   : > { %1313 = vmatpush.bf16.msra.mxu0 %v2680_v57  ;;  %v1175_v60 = vperm.slane %v3693_v59, 0  ;;  %v1177_v3 = vperm.slane %v3693_v59, 2 }
 0x102   : > { %1327 = vmatpush.bf16.msra.mxu1 %v2684_v61  ;;  %v1176_v61 = vperm.slane %v3693_v59, 1 }
 0x103   : > { %1341 = vmatpush.bf16.msra.mxu2 %v2688_v62 }
 0x105   : > { %1314 = vmatpush.bf16.msra.mxu0 %v2668_v4 }
 0x106   : > { %1328 = vmatpush.bf16.msra.mxu1 %v2672_v8 }
 0x166   : > { %v1085_v7 = vpop.xlane.xlu0 %1084 }
 0x167   : > { %v1094_v12 = vmul.f32 %v3615_v9, %v1085_v7  ;;  %v2943_v7 = vld [vmem:[%s3249_s26 + $0x40] sm:$0xf0] }
 0x169   : > { %v3625_v15 = vsub.f32 %v3608_v63, %v1094_v12  ;;  %v2939_v12 = vld [vmem:[%s3249_s26 + $0x20] sm:$0xf0] }
 0x16b   : > { %v1098_v16 = vmul.f32 %v3625_v15, %v3625_v15 }
 0x16d   : > { %v1101_v17 = vsel %vm1082_vm3, %v1098_v16, 0.0 }
 0x16e   : > { %v1081_v10 = vpop.xlane.xlu0 %1080 }
 0x16f   : > { %v1093_v11 = vmul.f32 %v3615_v9, %v1081_v10  ;;  %v2676_v10 = vor.u32 %v2943_v7, %v2675_v6 }
 0x171   : > { %v3620_v13 = vsub.f32 %v3612_v1, %v1093_v11  ;;  %1342 = vmatpush.bf16.msra.mxu2 %v2676_v10  ;;  %v2655_v11 = vld [vmem:[%s3249_s26 + $0x18] sm:$0xf] }
 0x172   : > { %v2656_v16 = vor.u32 %v2939_v12, %v2655_v11 }
 0x173   : > { %v1097_v14 = vmul.f32 %v3620_v13, %v3620_v13 }
 0x174   : > { %1315 = vmatpush.bf16.msra.mxu0 %v2656_v16 }
 0x175   : > { %1099 = vadd.xlane.f32.xlu1 %v1097_v14  ;;  %v2938_v14 = vld [vmem:[%s3249_s26 + $0x1c] sm:$0xf]  ;;  %1343 = vmatpush.bf16.msra.mxu2 %v2664_v21 }
 0x178   : > { %1316 = vmatpush.bf16.msra.mxu0 %v2644_v26 }
 0x179   : > { %1344 = vmatpush.bf16.msra.mxu2 %v2652_v32 }
 0x17d   : > { %1102 = vadd.xlane.f32.xlu1 %v1101_v17  ;;  %v2657_v17 = vld [vmem:[%s3249_s26 + $0x24] sm:$0xf0]  ;;  %s4036_s26 = scalar_lea.vmem %s3997_s10, %s3228_s20 }
 0x17e   : > { %v2660_v20 = vor.u32 %v2938_v14, %v2657_v17 }
 0x180   : > { %1329 = vmatpush.bf16.msra.mxu1 %v2660_v20 }
 0x184   : > { %1330 = vmatpush.bf16.msra.mxu1 %v2648_v31 }
 0x1e8   : > { %v1100_v25 = vpop.xlane.xlu1 %1099 }
 0x1e9   : > { %v1104_v30 = vmul.f32 %v1100_v25, %v3615_v9 }
 0x1eb   : > { %v1106_v33 = vadd.f32 1e-06, %v1104_v30 }
 0x1ed   : > { %3038 = vrsqrt.f32 %v1106_v33  ;;  %vm1114_vm6 = vweird.f32 %v1106_v33 }
 0x1f0   : > { %v1103_v34 = vpop.xlane.xlu1 %1102 }
 0x1f1   : > { %v1105_v35 = vmul.f32 %v1103_v34, %v3615_v9 }
 0x1f3   : > { %v3039_v36 = vpop.eup %3038  ;;  %v1107_v37 = vadd.f32 1e-06, %v1105_v35 }
 0x1f4   : > { %v1109_v38 = vmul.f32 %v3039_v36, %v1106_v33  ;;  %vm1115_vm5 = vweird.f32 %v3039_v36 }
 0x1f5   : > { %3040 = vrsqrt.f32 %v1107_v37  ;;  %vm1116_vm7 = vmor %vm1114_vm6, %vm1115_vm5  ;;  %vm1124_vm9 = vweird.f32 %v1107_v37 }
 0x1f6   : > { %v1110_v39 = vmul.f32 %v3039_v36, %v1109_v38 }
 0x1f8   : > { %v1111_v40 = vmul.f32 0.5, %v1110_v39 }
 0x1fa   : > { %v1112_v41 = vsub.f32 1.5, %v1111_v40 }
 0x1fb   : > { %v3041_v42 = vpop.eup %3040 }
 0x1fc   : > { %v1113_v43 = vmul.f32 %v3039_v36, %v1112_v41  ;;  %v1119_v44 = vmul.f32 %v3041_v42, %v1107_v37  ;;  %vm1125_vm8 = vweird.f32 %v3041_v42 }
 0x1fd   : > { %vm1126_vm10 = vmor %vm1124_vm9, %vm1125_vm8 }
 0x1fe   : > { %v1120_v45 = vmul.f32 %v3041_v42, %v1119_v44  ;;  %v1117_v46 = vsel %vm1116_vm7, %v3039_v36, %v1113_v43 }
 0x1ff   : > { %v1128_v49 = vmul.f32 %v1117_v46, %v3620_v13 }
 0x200   : > { %v1121_v47 = vmul.f32 0.5, %v1120_v45 }
 0x201   : > { %v1133_v54 = vmul.f32 %v3030_v50, %v1128_v49 }
 0x202   : > { %v1122_v48 = vsub.f32 1.5, %v1121_v47 }
 0x203   : > { %v1138_v13 = vadd.f32 %v3031_v55, %v1133_v54 }
 0x204   : > { %v1123_v51 = vmul.f32 %v3041_v42, %v1122_v48 }
 0x206   : > { %v1127_v52 = vsel %vm1126_vm10, %v3041_v42, %v1123_v51 }
 0x207   : > { %v1129_v53 = vmul.f32 %v1127_v52, %v3625_v15 }
 0x209   : > { %v1134_v56 = vmul.f32 %v3030_v50, %v1129_v53 }
 0x20b   : > { %v1139_v57 = vadd.f32 %v3031_v55, %v1134_v56 }
 0x20d   : > { %v1140_v58 = vpack.c.bf16 %v1139_v57, %v1138_v13 }
 0x20f   : > { %1317 = vmatmul.bf16.vlgmr.msra.gmra.mxu0 %v1140_v58  ;;  %1331 = vmatmul.bf16.vlgmr.msra.gmra.mxu1 %v1140_v58 }
 0x210   : > { %1345 = vmatmul.bf16.vlgmr.msra.gmra.mxu2 %v1140_v58 }
 0x28c   : > { %v1318_v15 = vpop.f32.mrf.mxu0  ;;  %v1332_v62 = vpop.f32.mrf.mxu1 }
 0x28d   : > { %v3699_v0 = vadd.f32 %v1318_v15, %v1175_v60  ;;  %v3703_v2 = vadd.f32 %v1332_v62, %v1176_v61 }
 0x28f   : > { %1421 = vrot.lane.b32.xlu0 %v3703_v2, %s3100_s18  ;;  %2737 = vmatpush.xpose.msk.msra.mxu3 %vm1351_vm11, %v3703_v2  ;;  %v1643_v39 = vrot.slane %v3703_v2, 5  ;;  %v1639_v44 = vrot.slane %v3699_v0, 5 }
 0x290   : > { %1419 = vrot.lane.b32.xlu1 %v3699_v0, %s3100_s18 }
 0x292   : > { %2738 = vmatmul.msk.f32.vlgmr.msra.gmra.mxu3 %vm1351_vm11, %v3699_v0 }
 0x293   : > { %v1346_v4 = vpop.f32.mrf.mxu2 }
 0x294   : > { %v3714_v5 = vadd.f32 %v1346_v4, %v1177_v3  ;;  %v1334_v36 = vpop.f32.mrf.mxu1  ;;  %v1320_v41 = vpop.f32.mrf.mxu0 }
 0x295   : > { %v1335_v37 = vadd.f32 %v1334_v36, %v1176_v61  ;;  %v1321_v42 = vadd.f32 %v1320_v41, %v1175_v60 }
 0x296   : > { %2739 = vmatpush.msk.msrb.mxu3 %vm1395_vm12, %v3714_v5  ;;  %v1683_v8 = vrot.slane %v3714_v5, 5 }
 0x297   : > { %1488 = vrot.lane.b32.xlu0 %v3703_v2, %s3101_s5  ;;  %v1644_v38 = vrot.slane %v1335_v37, 5  ;;  %v1640_v43 = vrot.slane %v1321_v42, 5 }
 0x298   : > { %1486 = vrot.lane.b32.xlu1 %v3699_v0, %s3101_s5 }
 0x299   : > { %v1645_v40 = vsel %vm1638_vm13, %v1643_v39, %v1644_v38  ;;  %v1641_v45 = vsel %vm1638_vm13, %v1639_v44, %v1640_v43 }
 0x29b   : > { %v1348_v6 = vpop.f32.mrf.mxu2 }
 0x29c   : > { %v1349_v7 = vadd.f32 %v1348_v6, %v1177_v3 }
 0x29e   : > { %v1684_v10 = vrot.slane %v1349_v7, 5 }
 0x2a0   : > { %v3724_v11 = vsel %vm1638_vm13, %v1683_v8, %v1684_v10 }
 0x301   : > { %v1422_v12 = vpop.permute.xlu0 %1421 }
 0x302   : > { %2741 = vmatpush.xpose.msk.msra.mxu3 %vm1351_vm11, %v1422_v12  ;;  %v1420_v26 = vpop.permute.xlu1 %1419 }
 0x309   : > { %v1489_v50 = vpop.permute.xlu0 %1488 }
 0x30a   : > { %v1487_v52 = vpop.permute.xlu1 %1486 }
 0x315   : > { %v1375_v14 = vpop.f32.mrf.mxu3 }
 0x316   : > { %v1378_v16 = vmul.f32 0.17677669, %v1375_v14 }
 0x318   : > { %v1380_v17 = vsel %vm1379_vm14, %v1378_v16, -inf }
 0x319   : > { %1381 = vmax.xlane.f32.xlu2 %v1380_v17 }
 0x38c   : > { %v1382_v18 = vpop.xlane.xlu2 %1381 }
 0x38d   : > { %v1383_v19 = vsub.f32 %v1378_v16, %v1382_v18 }
 0x38f   : > { %v1384_v20 = vmul.f32 1.442695, %v1383_v19 }
 0x391   : > { %3042 = vpow2.f32 %v1384_v20 }
 0x397   : > { %v3043_v21 = vpop.eup %3042 }
 0x398   : > { %v1386_v22 = vsel %vm1379_vm14, %v3043_v21, 0.0 }
 0x399   : > { %1387 = vadd.xlane.f32.xlu2 %v1386_v22 }
 0x40c   : > { %v1388_v23 = vpop.xlane.xlu2 %1387 }
 0x40d   : > { %3044 = vrcp.f32 %v1388_v23 }
 0x413   : > { %v3045_v24 = vpop.eup %3044 }
 0x414   : > { %v1390_v25 = vmul.f32 %v3045_v24, %v3043_v21 }
 0x416   : > { %2740 = vmatmul.msk.f32.vlgmr.msrb.gmra.mxu3 %vm1391_vm15, %v1390_v25 }
 0x41e   : > { %2742 = vmatmul.msk.f32.vlgmr.msra.gmra.mxu3 %vm1351_vm11, %v1420_v26 }
 0x499   : > { %v3731_v27 = vpop.f32.mrf.mxu3 }
 0x4a1   : > { %v1444_v28 = vpop.f32.mrf.mxu3 }
 0x4a2   : > { %v1447_v29 = vmul.f32 0.17677669, %v1444_v28 }
 0x4a4   : > { %v1448_v30 = vsel %vm1379_vm14, %v1447_v29, -inf }
 0x4a5   : > { %1449 = vmax.xlane.f32.xlu2 %v1448_v30 }
 0x518   : > { %v1450_v31 = vpop.xlane.xlu2 %1449 }
 0x519   : > { %v1451_v32 = vsub.f32 %v1447_v29, %v1450_v31 }
 0x51b   : > { %v1452_v33 = vmul.f32 1.442695, %v1451_v32 }
 0x51d   : > { %3046 = vpow2.f32 %v1452_v33 }
 0x523   : > { %v3047_v34 = vpop.eup %3046 }
 0x524   : > { %v1454_v35 = vsel %vm1379_vm14, %v3047_v34, 0.0 }
 0x525   : > { %1455 = vadd.xlane.f32.xlu2 %v1454_v35 }
 0x53d   : > { %1459 = vrot.lane.b32.xlu2 %v3714_v5, %s3100_s18 }
 0x545   : > { %1526 = vrot.lane.b32.xlu2 %v3714_v5, %s3101_s5 }
 0x54d   : > { %1555 = vrot.lane.b32.xlu2 %v3703_v2, %s3102_s22 }
 0x555   : > { %1553 = vrot.lane.b32.xlu2 %v3699_v0, %s3102_s22 }
 0x55d   : > { %1713 = vrot.lane.b32.xlu2 %v1645_v40, %s3100_s18 }
 0x565   : > { %1780 = vrot.lane.b32.xlu2 %v1645_v40, %s3101_s5 }
 0x56d   : > { %1847 = vrot.lane.b32.xlu2 %v1645_v40, %s3102_s22 }
 0x575   : > { %1845 = vrot.lane.b32.xlu2 %v1641_v45, %s3102_s22 }
 0x598   : > { %v1456_v46 = vpop.xlane.xlu2 %1455 }
 0x599   : > { %3048 = vrcp.f32 %v1456_v46 }
 0x59f   : > { %v3049_v47 = vpop.eup %3048 }
 0x5a0   : > { %v1458_v48 = vmul.f32 %v3049_v47, %v3047_v34  ;;  %v1460_v49 = vpop.permute.xlu2 %1459 }
 0x5a1   : > { %2743 = vmatpush.msk.msrb.mxu3 %vm1395_vm12, %v1460_v49 }
 0x5a2   : > { %2744 = vmatmul.msk.f32.vlgmr.msrb.gmra.mxu3 %vm1391_vm15, %v1458_v48 }
 0x5a3   : > { %2745 = vmatpush.xpose.msk.msra.mxu3 %vm1351_vm11, %v1489_v50 }
 0x5a8   : > { %v1527_v51 = vpop.permute.xlu2 %1526 }
 0x5a9   : > { %2747 = vmatpush.msk.msrb.mxu3 %vm1395_vm12, %v1527_v51 }
 0x5aa   : > { %2746 = vmatmul.msk.f32.vlgmr.msra.gmra.mxu3 %vm1351_vm11, %v1487_v52 }
 0x5ab   : > { %2753 = vmatpush.xpose.msk.msra.mxu3 %vm1351_vm11, %v1645_v40 }
 0x5b0   : > { %v1556_v53 = vpop.permute.xlu2 %1555 }
 0x5b1   : > { %2749 = vmatpush.xpose.msk.msrb.mxu0 %vm1351_vm11, %v1556_v53 }
 0x5b8   : > { %v1554_v54 = vpop.permute.xlu2 %1553 }
 0x5b9   : > { %2750 = vmatmul.msk.f32.vlgmr.msrb.gmra.mxu0 %vm1351_vm11, %v1554_v54 }
 0x5c0   : > { %v1714_v55 = vpop.permute.xlu2 %1713 }
 0x5c1   : > { %2757 = vmatpush.xpose.msk.msra.mxu0 %vm1351_vm11, %v1714_v55 }
 0x5c8   : > { %v1781_v56 = vpop.permute.xlu2 %1780 }
 0x5c9   : > { %2761 = vmatpush.xpose.msk.msrb.mxu0 %vm1351_vm11, %v1781_v56 }
 0x5d0   : > { %v1848_v7 = vpop.permute.xlu2 %1847 }
 0x5d8   : > { %v1846_v19 = vpop.permute.xlu2 %1845 }
 0x625   : > { %v3765_v13 = vpop.f32.mrf.mxu3 }
 0x62d   : > { %v1511_v57 = vpop.f32.mrf.mxu3 }
 0x62e   : > { %v1514_v58 = vmul.f32 0.17677669, %v1511_v57 }
 0x630   : > { %v1515_v59 = vsel %vm1379_vm14, %v1514_v58, -inf }
 0x631   : > { %1516 = vmax.xlane.f32.xlu0 %v1515_v59 }
 0x636   : > { %v1578_v60 = vpop.f32.mrf.mxu0 }
 0x637   : > { %v1581_v61 = vmul.f32 0.17677669, %v1578_v60 }
 0x639   : > { %v1582_v15 = vsel %vm1379_vm14, %v1581_v61, -inf }
 0x645   : > { %1711 = vrot.lane.b32.xlu0 %v1641_v45, %s3100_s18 }
 0x66f   : > { %1583 = vmax.xlane.f32.xlu0 %v1582_v15 }
 0x6a4   : > { %v1517_v62 = vpop.xlane.xlu0 %1516 }
 0x6a5   : > { %v1518_v0 = vsub.f32 %v1514_v58, %v1517_v62 }
 0x6a7   : > { %v1519_v2 = vmul.f32 1.442695, %v1518_v0 }
 0x6a9   : > { %3050 = vpow2.f32 %v1519_v2 }
 0x6af   : > { %v3051_v3 = vpop.eup %3050 }
 0x6b0   : > { %v1521_v4 = vsel %vm1379_vm14, %v3051_v3, 0.0 }
 0x6b1   : > { %1522 = vadd.xlane.f32.xlu1 %v1521_v4 }
 0x6b7   : > { %v1712_v6 = vpop.permute.xlu0 %1711 }
 0x6b8   : > { %2758 = vmatmul.msk.f32.vlgmr.msra.gmra.mxu0 %vm1351_vm11, %v1712_v6 }
 0x6b9   : > { %2765 = vmatpush.xpose.msk.msra.mxu0 %vm1351_vm11, %v1848_v7 }
 0x6ca   : > { %1778 = vrot.lane.b32.xlu1 %v1641_v45, %s3101_s5 }
 0x6e2   : > { %v1584_v20 = vpop.xlane.xlu0 %1583 }
 0x6e3   : > { %v1585_v22 = vsub.f32 %v1581_v61, %v1584_v20 }
 0x6e5   : > { %v1586_v23 = vmul.f32 1.442695, %v1585_v22 }
 0x724   : > { %v1523_v8 = vpop.xlane.xlu1 %1522 }
 0x725   : > { %3052 = vrcp.f32 %v1523_v8 }
 0x726   : > { %3054 = vpow2.f32 %v1586_v23 }
 0x72b   : > { %v3053_v10 = vpop.eup %3052 }
 0x72c   : > { %v1525_v12 = vmul.f32 %v3053_v10, %v3051_v3  ;;  %v3055_v34 = vpop.eup %3054 }
 0x72d   : > { %v1588_v37 = vsel %vm1379_vm14, %v3055_v34, 0.0 }
 0x72e   : > { %2748 = vmatmul.msk.f32.vlgmr.msrb.gmra.mxu3 %vm1391_vm15, %v1525_v12 }
 0x72f   : > { %2755 = vmatpush.msk.msrb.mxu3 %vm1395_vm12, %v3724_v11 }
 0x735   : > { %v1736_v14 = vpop.f32.mrf.mxu0 }
 0x736   : > { %v1739_v16 = vmul.f32 0.17677669, %v1736_v14  ;;  %2754 = vmatmul.msk.f32.vlgmr.msra.gmra.mxu3 %vm1351_vm11, %v1641_v45  ;;  %v2966_v14 = vld [vmem:[%s3244_s25 + $0x38] sm:$0xff] }
 0x737   : > { %2000 = vmatpush.bf16.msrb.mxu2 %v2966_v14  ;;  %v2843_v14 = vld [vmem:[%s3272_s7 + $0x50] sm:$0xf] }
 0x738   : > { %v1740_v17 = vsel %vm1379_vm14, %v1739_v16, -inf }
 0x739   : > { %1741 = vmax.xlane.f32.xlu1 %v1740_v17  ;;  %v2964_v17 = vld [vmem:[%s3244_s25 + $0x28] sm:$0xff] }
 0x73c   : > { %v1779_v18 = vpop.permute.xlu1 %1778 }
 0x73d   : > { %2762 = vmatmul.msk.f32.vlgmr.msrb.gmra.mxu0 %vm1351_vm11, %v1779_v18  ;;  %v2963_v18 = vld [vmem:[%s3244_s25 + $0x20] sm:$0xff] }
 0x745   : > { %2766 = vmatmul.msk.f32.vlgmr.msra.gmra.mxu0 %vm1351_vm11, %v1846_v19 }
 0x7ac   : > { %v1742_v24 = vpop.xlane.xlu1 %1741 }
 0x7ad   : > { %v1743_v30 = vsub.f32 %v1739_v16, %v1742_v24  ;;  %v2965_v16 = vld [vmem:[%s3244_s25 + $0x30] sm:$0xff] }
 0x7ae   : > { %2001 = vmatpush.bf16.msrb.mxu2 %v2965_v16  ;;  %v2978_v16 = vld [vmem:[%s3272_s7 + $0x54] sm:$0xf0] }
 0x7af   : > { %v1744_v33 = vmul.f32 1.442695, %v1743_v30  ;;  %v2961_v30 = vld [vmem:[%s3244_s25 + $0x10] sm:$0xff] }
 0x7b1   : > { %v3781_v21 = vpop.f32.mrf.mxu3  ;;  %3056 = vpow2.f32 %v1744_v33 }
 0x7b2   : > { %2002 = vmatpush.bf16.msrb.mxu2 %v2964_v17  ;;  %v2977_v17 = vld [vmem:[%s3272_s7 + $0x54] sm:$0xf] }
 0x7b6   : > { %2003 = vmatpush.bf16.msrb.mxu2 %v2963_v18  ;;  %v2844_v18 = vor.u32 %v2978_v16, %v2843_v14 }
 0x7b7   : > { %v3057_v39 = vpop.eup %3056 }
 0x7b8   : > { %v1746_v40 = vsel %vm1379_vm14, %v3057_v39, 0.0 }
 0x7b9   : > { %v1667_v25 = vpop.f32.mrf.mxu3 }
 0x7ba   : > { %v1670_v26 = vmul.f32 0.17677669, %v1667_v25  ;;  %v1803_v28 = vpop.f32.mrf.mxu0 }
 0x7bb   : > { %v1806_v29 = vmul.f32 0.17677669, %v1803_v28 }
 0x7bc   : > { %v1671_v31 = vsel %vm1379_vm14, %v1670_v26, -inf }
 0x7bd   : > { %1672 = vmax.xlane.f32.xlu2 %v1671_v31  ;;  %v1807_v32 = vsel %vm1379_vm14, %v1806_v29, -inf  ;;  %v2960_v31 = vld [vmem:[%s3244_s25 + $0x8] sm:$0xff] }
 0x7be   : > { %1808 = vmax.xlane.f32.xlu0 %v1807_v32  ;;  %v2959_v32 = vld [vmem:[%s3244_s25] sm:$0xff] }
 0x7c2   : > { %v1870_v35 = vpop.f32.mrf.mxu0 }
 0x7c3   : > { %v1873_v36 = vmul.f32 0.17677669, %v1870_v35 }
 0x7c5   : > { %v1874_v38 = vsel %vm1379_vm14, %v1873_v36, -inf }
 0x7c6   : > { %1589 = vadd.xlane.f32.xlu0 %v1588_v37  ;;  %1875 = vmax.xlane.f32.xlu2 %v1874_v38 }
 0x7ce   : > { %1747 = vadd.xlane.f32.xlu2 %v1746_v40 }
 0x7da   : > { %1593 = vrot.lane.b32.xlu0 %v3714_v5, %s3102_s22 }
 0x7e2   : > { %1885 = vrot.lane.b32.xlu0 %v3724_v11, %s3102_s22 }
 0x830   : > { %v1673_v41 = vpop.xlane.xlu2 %1672 }
 0x831   : > { %v1809_v42 = vpop.xlane.xlu0 %1808  ;;  %v1674_v44 = vsub.f32 %v1670_v26, %v1673_v41 }
 0x832   : > { %v1810_v43 = vsub.f32 %v1806_v29, %v1809_v42  ;;  %v2962_v29 = vld [vmem:[%s3244_s25 + $0x18] sm:$0xff] }
 0x833   : > { %v1675_v46 = vmul.f32 1.442695, %v1674_v44  ;;  %2004 = vmatpush.bf16.msrb.mxu2 %v2962_v29  ;;  %v2827_v29 = vld [vmem:[%s3272_s7 + $0x30] sm:$0xf] }
 0x834   : > { %v1811_v45 = vmul.f32 1.442695, %v1810_v43 }
 0x836   : > { %3058 = vpow2.f32 %v1811_v45 }
 0x837   : > { %3060 = vpow2.f32 %v1675_v46  ;;  %2005 = vmatpush.bf16.msrb.mxu2 %v2961_v30  ;;  %v2974_v30 = vld [vmem:[%s3272_s7 + $0x34] sm:$0xf0] }
 0x839   : > { %v1876_v47 = vpop.xlane.xlu2 %1875  ;;  %v1590_v5 = vpop.xlane.xlu0 %1589 }
 0x83a   : > { %v1877_v48 = vsub.f32 %v1873_v36, %v1876_v47 }
 0x83b   : > { %2006 = vmatpush.bf16.msrb.mxu2 %v2960_v31  ;;  %v2973_v31 = vld [vmem:[%s3272_s7 + $0x34] sm:$0xf] }
 0x83c   : > { %v3059_v49 = vpop.eup %3058  ;;  %v1878_v50 = vmul.f32 1.442695, %v1877_v48 }
 0x83d   : > { %v1813_v51 = vsel %vm1379_vm14, %v3059_v49, 0.0  ;;  %v3061_v52 = vpop.eup %3060 }
 0x83e   : > { %3062 = vpow2.f32 %v1878_v50  ;;  %1814 = vadd.xlane.f32.xlu1 %v1813_v51  ;;  %v1677_v54 = vsel %vm1379_vm14, %v3061_v52, 0.0 }
 0x83f   : > { %3064 = vrcp.f32 %v1590_v5  ;;  %2007 = vmatpush.bf16.msrb.mxu2 %v2959_v32  ;;  %v2828_v32 = vor.u32 %v2974_v30, %v2827_v29  ;;  %v2987_v29 = vld [vmem:[%s3283_s17 + $0x20] sm:$0xff]  ;;  %v2993_v30 = vld [vmem:[%s3283_s17 + $0x50] sm:$0xff] }
 0x841   : > { %v1748_v59 = vpop.xlane.xlu2 %1747 }
 0x844   : > { %v3063_v53 = vpop.eup %3062 }
 0x845   : > { %v1880_v55 = vsel %vm1379_vm14, %v3063_v53, 0.0  ;;  %v3065_v56 = vpop.eup %3064 }
 0x846   : > { %1678 = vadd.xlane.f32.xlu1 %v1677_v54  ;;  %1881 = vadd.xlane.f32.xlu2 %v1880_v55  ;;  %v1592_v58 = vmul.f32 %v3065_v56, %v3055_v34 }
 0x84c   : > { %v1594_v57 = vpop.permute.xlu0 %1593 }
 0x84d   : > { %2751 = vmatpush.msk.msrb.mxu1 %vm1395_vm12, %v1594_v57 }
 0x84e   : > { %2752 = vmatmul.msk.f32.vlgmr.msrb.gmra.mxu1 %vm1391_vm15, %v1592_v58 }
 0x854   : > { %v1886_v8 = vpop.permute.xlu0 %1885 }
 0x85e   : > { %1818 = vrot.lane.b32.xlu2 %v3724_v11, %s3101_s5 }
 0x85f   : > { %1751 = vrot.lane.b32.xlu1 %v3724_v11, %s3100_s18 }
 0x8b1   : > { %v1815_v60 = vpop.xlane.xlu1 %1814 }
 0x8b9   : > { %v1679_v61 = vpop.xlane.xlu1 %1678  ;;  %v1882_v15 = vpop.xlane.xlu2 %1881 }
 0x8ba   : > { %3066 = vrcp.f32 %v1679_v61 }
 0x8bb   : > { %3068 = vrcp.f32 %v1815_v60 }
 0x8bc   : > { %3070 = vrcp.f32 %v1748_v59 }
 0x8bd   : > { %3072 = vrcp.f32 %v1882_v15  ;;  %v2859_v15 = vld [vmem:[%s3272_s7 + $0x70] sm:$0xf] }
 0x8c0   : > { %v3067_v62 = vpop.eup %3066 }
 0x8c1   : > { %v1681_v0 = vmul.f32 %v3067_v62, %v3061_v52  ;;  %v1819_v2 = vpop.permute.xlu2 %1818  ;;  %v3069_v3 = vpop.eup %3068  ;;  %v2982_v62 = vld [vmem:[%s3272_s7 + $0x74] sm:$0xf0] }
 0x8c2   : > { %2763 = vmatpush.msk.msra.mxu3 %vm1395_vm12, %v1819_v2  ;;  %v1817_v4 = vmul.f32 %v3069_v3, %v3059_v49  ;;  %v3071_v11 = vpop.eup %3070  ;;  %v3032_v49 = vld [vmem:[%s4036_s26] ss:$0 sm:$0xff]  ;;  %v2860_v2 = vor.u32 %v2982_v62, %v2859_v15  ;;  %v2861_v3 = vld [vmem:[%s3272_s7 + $0x78] sm:$0xf0] }
 0x8c3   : > { %2756 = vmatmul.msk.f32.vlgmr.msrb.gmra.mxu3 %vm1391_vm15, %v1681_v0  ;;  %v1750_v6 = vmul.f32 %v3071_v11, %v3057_v39  ;;  %v3073_v10 = vpop.eup %3072  ;;  %v2981_v0 = vld [vmem:[%s3272_s7 + $0x74] sm:$0xf]  ;;  %v2851_v11 = vld [vmem:[%s3272_s7 + $0x60] sm:$0xf] }
 0x8c4   : > { %v1884_v12 = vmul.f32 %v3073_v10, %v3063_v53  ;;  %2173 = vmatpush.bf16.msrb.mxu3 %v2860_v2  ;;  %v2853_v10 = vld [vmem:[%s3272_s7 + $0x68] sm:$0xf0] }
 0x8cb   : > { %2764 = vmatmul.msk.f32.vlgmr.msra.gmra.mxu3 %vm1391_vm15, %v1817_v4  ;;  %v1617_v20 = vpop.f32.mrf.mxu1  ;;  %v2864_v4 = vor.u32 %v2981_v0, %v2861_v3 }
 0x8cd   : > { %2187 = vmatpush.bf16.msrb.mxu0 %v2864_v4 }
 0x8d1   : > { %v1752_v7 = vpop.permute.xlu1 %1751 }
 0x8d2   : > { %2759 = vmatpush.msk.msra.mxu1 %vm1395_vm12, %v1752_v7  ;;  %v2979_v7 = vld [vmem:[%s3272_s7 + $0x64] sm:$0xf] }
 0x8d3   : > { %2760 = vmatmul.msk.f32.vlgmr.msra.gmra.mxu1 %vm1391_vm15, %v1750_v6  ;;  %v2980_v6 = vld [vmem:[%s3272_s7 + $0x64] sm:$0xf0] }
 0x8d4   : > { %2767 = vmatpush.msk.msrb.mxu1 %vm1395_vm12, %v1886_v8  ;;  %v2852_v8 = vor.u32 %v2980_v6, %v2851_v11 }
 0x8d6   : > { %2174 = vmatpush.bf16.msrb.mxu3 %v2852_v8 }
 0x8da   : > { %2175 = vmatpush.bf16.msrb.mxu3 %v2844_v18 }
 0x8db   : > { %2768 = vmatmul.msk.f32.vlgmr.msrb.gmra.mxu1 %vm1391_vm15, %v1884_v12  ;;  %v2856_v12 = vor.u32 %v2979_v7, %v2853_v10  ;;  %v3033_v7 = vld [vmem:[%s4037_s0] ss:$0 sm:$0xff] }
 0x8dd   : > { %2188 = vmatpush.bf16.msrb.mxu0 %v2856_v12 }
 0x946   : > { %v1708_v19 = vpop.f32.mrf.mxu3 }
 0x94e   : > { %v1842_v22 = vpop.f32.mrf.mxu3 }
 0x94f   : > { %v3020_v23 = vpack.i.bf16 %v3781_v21, %v1842_v22  ;;  %v2835_v22 = vld [vmem:[%s3272_s7 + $0x40] sm:$0xf] }
 0x950   : > { %v1775_v24 = vpop.f32.mrf.mxu1 }
 0x951   : > { %v3015_v25 = vpack.i.bf16 %v3765_v13, %v1775_v24  ;;  %3021 = vrot.lane.b32.xlu1 %v3020_v23, %s3101_s5  ;;  %v2976_v23 = vld [vmem:[%s3272_s7 + $0x44] sm:$0xf0]  ;;  %v2975_v24 = vld [vmem:[%s3272_s7 + $0x44] sm:$0xf] }
 0x953   : > { %3016 = vrot.lane.b32.xlu0 %v3015_v25, %s3102_s22  ;;  %v2836_v25 = vor.u32 %v2976_v23, %v2835_v22  ;;  %v2990_v22 = vld [vmem:[%s3283_s17 + $0x38] sm:$0xff]  ;;  %v2996_v23 = vld [vmem:[%s3283_s17 + $0x68] sm:$0xff] }
 0x954   : > { %2371 = vmatpush.bf16.msra.mxu1 %v2990_v22 }
 0x955   : > { %2176 = vmatpush.bf16.msrb.mxu3 %v2836_v25  ;;  %v2995_v25 = vld [vmem:[%s3283_s17 + $0x60] sm:$0xff] }
 0x958   : > { %v1909_v26 = vpop.f32.mrf.mxu1 }
 0x959   : > { %v3025_v28 = vpack.i.bf16 %v1617_v20, %v1909_v26  ;;  %v2837_v26 = vld [vmem:[%s3272_s7 + $0x48] sm:$0xf0]  ;;  %2177 = vmatpush.bf16.msrb.mxu3 %v2828_v32 }
 0x95a   : > { %v2992_v32 = vld [vmem:[%s3283_s17 + $0x48] sm:$0xff] }
 0x95b   : > { %3026 = vrot.lane.b32.xlu0 %v3025_v28, %s3100_s18  ;;  %v2840_v28 = vor.u32 %v2975_v24, %v2837_v26  ;;  %v2989_v24 = vld [vmem:[%s3283_s17 + $0x30] sm:$0xff]  ;;  %v2988_v26 = vld [vmem:[%s3283_s17 + $0x28] sm:$0xff] }
 0x95c   : > { %2372 = vmatpush.bf16.msra.mxu1 %v2989_v24  ;;  %v3035_v24 = vld [vmem:[%s821_s2] ss:$0 sm:$0xff]  ;;  %s4040_s2 = sld [smem:[#allocation14_spill]] (!%p2929_p5) }
 0x960   : > { %2373 = vmatpush.bf16.msra.mxu1 %v2988_v26 }
 0x964   : > { %2374 = vmatpush.bf16.msra.mxu1 %v2987_v29 }
 0x9c3   : > { %v3022_v34 = vpop.permute.xlu1 %3021 }
 0x9c4   : > { %v3023_v36 = vunpack.i.l.bf16 %v3022_v34  ;;  %v3024_v41 = vunpack.i.h.bf16 %v3022_v34  ;;  %v2819_v34 = vld [vmem:[%s3272_s7 + $0x20] sm:$0xf] }
 0x9c5   : > { %v3017_v21 = vpop.permute.xlu0 %3016 }
 0x9c6   : > { %v3018_v33 = vunpack.i.l.bf16 %v3017_v21  ;;  %v3019_v13 = vunpack.i.h.bf16 %v3017_v21  ;;  %v2829_v21 = vld [vmem:[%s3272_s7 + $0x38] sm:$0xf0] }
 0x9c8   : > { %v1924_v35 = vsel %vm1351_vm11, %v1708_v19, %v3018_v33  ;;  %v1632_v38 = vsel %vm1351_vm11, %v3731_v27, %v3019_v13  ;;  %v2845_v19 = vld [vmem:[%s3272_s7 + $0x58] sm:$0xf0]  ;;  %v2832_v33 = vor.u32 %v2973_v31, %v2829_v21  ;;  %v2972_v13 = vld [vmem:[%s3272_s7 + $0x24] sm:$0xf0]  ;;  %v2087_v21 = vld [vmem:[%s3278_s1] sm:$0x3] }
 0x9c9   : > { %v1925_v42 = vsel %vm1633_vm0, %v1924_v35, %v3023_v36  ;;  %v1634_v44 = vsel %vm1633_vm0, %v1632_v38, %v3024_v41  ;;  %v2848_v20 = vor.u32 %v2977_v17, %v2845_v19  ;;  %v2971_v35 = vld [vmem:[%s3272_s7 + $0x24] sm:$0xf]  ;;  %v2820_v36 = vor.u32 %v2972_v13, %v2819_v34  ;;  %v2970_v41 = vld [vmem:[%s3272_s7 + $0x14] sm:$0xf0]  ;;  %s4039_s1 = sld [smem:[#allocation13_spill]] (!%p2929_p5) }
 0x9ca   : > { %v2986_v31 = vld [vmem:[%s3283_s17 + $0x18] sm:$0xff]  ;;  %v2991_v34 = vld [vmem:[%s3283_s17 + $0x40] sm:$0xff]  ;;  %v2090_v13 = vperm.slane %v2087_v21, 1 }
 0x9cb   : > { %2189 = vmatpush.bf16.msrb.mxu0 %v2848_v20  ;;  %2178 = vmatpush.bf16.msrb.mxu3 %v2820_v36  ;;  %v2998_v20 = vld [vmem:[%s3283_s17 + $0x78] sm:$0xff] }
 0x9cc   : > { %2385 = vmatpush.bf16.msra.mxu2 %v2998_v20  ;;  %2375 = vmatpush.bf16.msra.mxu1 %v2986_v31 }
 0x9cd   : > { %v3027_v37 = vpop.permute.xlu0 %3026 }
 0x9ce   : > { %v3029_v39 = vunpack.i.h.bf16 %v3027_v37  ;;  %v3028_v40 = vunpack.i.l.bf16 %v3027_v37  ;;  %v2821_v37 = vld [vmem:[%s3272_s7 + $0x28] sm:$0xf0] }
 0x9cf   : > { %2190 = vmatpush.bf16.msrb.mxu0 %v2840_v28  ;;  %v2824_v38 = vor.u32 %v2971_v35, %v2821_v37  ;;  %v2994_v28 = vld [vmem:[%s3283_s17 + $0x58] sm:$0xff]  ;;  %v2984_v35 = vld [vmem:[%s3283_s17 + $0x8] sm:$0xff] }
 0x9d0   : > { %v1926_v43 = vsel %vm1635_vm1, %v1925_v42, %v3028_v40  ;;  %v1636_v46 = vsel %vm1635_vm1, %v1634_v44, %v3029_v39  ;;  %v2811_v40 = vld [vmem:[%s3272_s7 + $0x10] sm:$0xf]  ;;  %v2969_v42 = vld [vmem:[%s3272_s7 + $0x14] sm:$0xf] }
 0x9d1   : > { %v1928_v45 = vrot.slane %v1926_v43, 3  ;;  %v2812_v44 = vor.u32 %v2970_v41, %v2811_v40  ;;  %v2089_v40 = vperm.slane %v2087_v21, 0 }
 0x9d3   : > { %v1930_v47 = vsel %vm1395_vm12, %v1636_v46, %v1928_v45  ;;  %2191 = vmatpush.bf16.msrb.mxu0 %v2832_v33  ;;  %v2803_v46 = vld [vmem:[%s3272_s7] sm:$0xf]  ;;  %2179 = vmatpush.bf16.msrb.mxu3 %v2812_v44  ;;  %v2985_v33 = vld [vmem:[%s3283_s17 + $0x10] sm:$0xff] }
 0x9d4   : > { %v1931_v48 = vpack.c.bf16 %v1928_v45, %v1930_v47  ;;  %v2813_v45 = vld [vmem:[%s3272_s7 + $0x18] sm:$0xf0]  ;;  %v2968_v47 = vld [vmem:[%s3272_s7 + $0x4] sm:$0xf0]  ;;  %2376 = vmatpush.bf16.msra.mxu1 %v2985_v33 }
 0x9d6   : > { %2008 = vmatmul.bf16.vlgmr.msrb.gmra.mxu2 %v1931_v48  ;;  %v2816_v48 = vor.u32 %v2969_v42, %v2813_v45 }
 0x9d7   : > { %2192 = vmatpush.bf16.msrb.mxu0 %v2824_v38  ;;  %v2983_v38 = vld [vmem:[%s3283_s17] sm:$0xff] }
 0x9d8   : > { %2377 = vmatpush.bf16.msra.mxu1 %v2984_v35 }
 0x9db   : > { %2193 = vmatpush.bf16.msrb.mxu0 %v2816_v48 }
 0x9dc   : > { %2378 = vmatpush.bf16.msra.mxu1 %v2983_v38 }
 0xa59   : > { %v2009_v50 = vpop.f32.mrf.mxu2 }
 0xa5a   : > { %v2010_v51 = vadd.f32 %v3032_v49, %v2009_v50  ;;  %v2805_v50 = vld [vmem:[%s3272_s7 + $0x8] sm:$0xf0] }
 0xa5c   : > { %v3831_v27 = vadd.f32 %v2010_v51, %v3612_v1 }
 0xa5e   : > { %2018 = vadd.xlane.f32.xlu1 %v3831_v27 }
 0xa61   : > { %v2011_v5 = vpop.f32.mrf.mxu2 }
 0xa62   : > { %v2012_v52 = vadd.f32 %v3032_v49, %v2011_v5  ;;  %v2967_v49 = vld [vmem:[%s3272_s7 + $0x4] sm:$0xf]  ;;  %v2804_v5 = vor.u32 %v2968_v47, %v2803_v46 }
 0xa64   : > { %v3835_v53 = vadd.f32 %v2012_v52, %v3608_v63  ;;  %v2808_v52 = vor.u32 %v2967_v49, %v2805_v50  ;;  %2180 = vmatpush.bf16.msrb.mxu3 %v2804_v5 }
 0xa66   : > { %v2020_v54 = vsel %vm1082_vm3, %v3835_v53, 0.0  ;;  %2194 = vmatpush.bf16.msrb.mxu0 %v2808_v52 }
 0xa67   : > { %2021 = vadd.xlane.f32.xlu2 %v2020_v54 }
 0xad1   : > { %v2019_v55 = vpop.xlane.xlu1 %2018 }
 0xad2   : > { %v2023_v56 = vmul.f32 %v2019_v55, %v3615_v9 }
 0xad4   : > { %v3841_v1 = vsub.f32 %v3831_v27, %v2023_v56 }
 0xad6   : > { %v2027_v57 = vmul.f32 %v3841_v1, %v3841_v1 }
 0xad8   : > { %2029 = vadd.xlane.f32.xlu0 %v2027_v57 }
 0xada   : > { %v2022_v63 = vpop.xlane.xlu2 %2021 }
 0xadb   : > { %v2024_v58 = vmul.f32 %v2022_v63, %v3615_v9 }
 0xadd   : > { %v3847_v59 = vsub.f32 %v3835_v53, %v2024_v58 }
 0xadf   : > { %v2028_v60 = vmul.f32 %v3847_v59, %v3847_v59 }
 0xae1   : > { %v2031_v61 = vsel %vm1082_vm3, %v2028_v60, 0.0 }
 0xae2   : > { %2032 = vadd.xlane.f32.xlu2 %v2031_v61 }
 0xb4b   : > { %v2030_v39 = vpop.xlane.xlu0 %2029 }
 0xb4c   : > { %v2034_v43 = vmul.f32 %v2030_v39, %v3615_v9 }
 0xb4e   : > { %v2036_v51 = vadd.f32 1e-06, %v2034_v43 }
 0xb50   : > { %3074 = vrsqrt.f32 %v2036_v51  ;;  %vm2044_vm4 = vweird.f32 %v2036_v51 }
 0xb55   : > { %v2033_v54 = vpop.xlane.xlu2 %2032 }
 0xb56   : > { %v3075_v55 = vpop.eup %3074  ;;  %v2035_v56 = vmul.f32 %v2033_v54, %v3615_v9 }
 0xb57   : > { %v2039_v57 = vmul.f32 %v3075_v55, %v2036_v51  ;;  %vm2045_vm2 = vweird.f32 %v3075_v55 }
 0xb58   : > { %v2037_v63 = vadd.f32 1e-06, %v2035_v56  ;;  %vm2046_vm5 = vmor %vm2044_vm4, %vm2045_vm2 }
 0xb59   : > { %v2040_v58 = vmul.f32 %v3075_v55, %v2039_v57 }
 0xb5a   : > { %3076 = vrsqrt.f32 %v2037_v63  ;;  %vm2054_vm7 = vweird.f32 %v2037_v63 }
 0xb5b   : > { %v2041_v60 = vmul.f32 0.5, %v2040_v58 }
 0xb5d   : > { %v2042_v61 = vsub.f32 1.5, %v2041_v60 }
 0xb5f   : > { %v2043_v62 = vmul.f32 %v3075_v55, %v2042_v61 }
 0xb60   : > { %v3077_v15 = vpop.eup %3076 }
 0xb61   : > { %v2049_v0 = vmul.f32 %v3077_v15, %v2037_v63  ;;  %v2047_v3 = vsel %vm2046_vm5, %v3075_v55, %v2043_v62  ;;  %vm2055_vm6 = vweird.f32 %v3077_v15 }
 0xb62   : > { %v2058_v6 = vmul.f32 %v2047_v3, %v3841_v1  ;;  %vm2056_vm8 = vmor %vm2054_vm7, %vm2055_vm6  ;;  %v3034_v1 = vld [vmem:[%s4038_s4] ss:$0 sm:$0xff] }
 0xb63   : > { %v2050_v2 = vmul.f32 %v3077_v15, %v2049_v0 }
 0xb64   : > { %v2063_v14 = vmul.f32 %v3033_v7, %v2058_v6 }
 0xb65   : > { %v2051_v4 = vmul.f32 0.5, %v2050_v2 }
 0xb66   : > { %v2068_v17 = vadd.f32 %v3034_v1, %v2063_v14 }
 0xb67   : > { %v2052_v11 = vsub.f32 1.5, %v2051_v4 }
 0xb69   : > { %v2053_v8 = vmul.f32 %v3077_v15, %v2052_v11 }
 0xb6b   : > { %v2057_v10 = vsel %vm2056_vm8, %v3077_v15, %v2053_v8 }
 0xb6c   : > { %v2059_v12 = vmul.f32 %v2057_v10, %v3847_v59  ;;  %v2997_v59 = vld [vmem:[%s3283_s17 + $0x70] sm:$0xff] }
 0xb6d   : > { %2386 = vmatpush.bf16.msra.mxu2 %v2997_v59 }
 0xb6e   : > { %v2064_v16 = vmul.f32 %v3033_v7, %v2059_v12 }
 0xb70   : > { %v2069_v18 = vadd.f32 %v3034_v1, %v2064_v16 }
 0xb71   : > { %2387 = vmatpush.bf16.msra.mxu2 %v2996_v23 }
 0xb72   : > { %v2070_v19 = vpack.c.bf16 %v2069_v18, %v2068_v17 }
 0xb74   : > { %2181 = vmatmul.bf16.vlgmr.msrb.gmra.mxu3 %v2070_v19  ;;  %2195 = vmatmul.bf16.vlgmr.msrb.gmra.mxu0 %v2070_v19 }
 0xb75   : > { %2388 = vmatpush.bf16.msra.mxu2 %v2995_v25 }
 0xb79   : > { %2389 = vmatpush.bf16.msra.mxu2 %v2994_v28 }
 0xb7d   : > { %2390 = vmatpush.bf16.msra.mxu2 %v2993_v30 }
 0xb81   : > { %2391 = vmatpush.bf16.msra.mxu2 %v2992_v32 }
 0xb85   : > { %2392 = vmatpush.bf16.msra.mxu2 %v2991_v34 }
 0xbf1   : > { %v2196_v36 = vpop.f32.mrf.mxu0 }
 0xbf2   : > { %v2197_v37 = vadd.f32 %v2196_v36, %v2090_v13 }
 0xbf4   : > { %v2206_v39 = vmul.f32 0.044715, %v2197_v37  ;;  %v2202_v6 = vmul.f32 0.5, %v2197_v37 }
 0xbf6   : > { %v2210_v41 = vmul.f32 %v2206_v39, %v2197_v37 }
 0xbf7   : > { %v2182_v42 = vpop.f32.mrf.mxu3 }
 0xbf8   : > { %v2214_v43 = vmul.f32 %v2210_v41, %v2197_v37  ;;  %v2183_v44 = vadd.f32 %v2182_v42, %v2089_v40 }
 0xbf9   : > { %v2198_v45 = vpop.f32.mrf.mxu0 }
 0xbfa   : > { %v2218_v46 = vadd.f32 %v2214_v43, %v2197_v37  ;;  %v2205_v47 = vmul.f32 0.044715, %v2183_v44  ;;  %v2199_v48 = vadd.f32 %v2198_v45, %v2090_v13  ;;  %v2201_v18 = vmul.f32 0.5, %v2183_v44 }
 0xbfc   : > { %v2209_v49 = vmul.f32 %v2205_v47, %v2183_v44  ;;  %v2208_v50 = vmul.f32 0.044715, %v2199_v48  ;;  %v2222_v51 = vmul.f32 0.7978846, %v2218_v46  ;;  %v2204_v7 = vmul.f32 0.5, %v2199_v48 }
 0xbfe   : > { %v2213_v5 = vmul.f32 %v2209_v49, %v2183_v44  ;;  %v2212_v52 = vmul.f32 %v2208_v50, %v2199_v48  ;;  %3078 = vtanh.f32 %v2222_v51 }
 0xbff   : > { %v2184_v54 = vpop.f32.mrf.mxu3 }
 0xc00   : > { %v2217_v55 = vadd.f32 %v2213_v5, %v2183_v44  ;;  %v2216_v56 = vmul.f32 %v2212_v52, %v2199_v48  ;;  %v2185_v57 = vadd.f32 %v2184_v54, %v2089_v40 }
 0xc02   : > { %v2220_v63 = vadd.f32 %v2216_v56, %v2199_v48  ;;  %v2207_v58 = vmul.f32 0.044715, %v2185_v57  ;;  %v2221_v60 = vmul.f32 0.7978846, %v2217_v55  ;;  %v2203_v19 = vmul.f32 0.5, %v2185_v57 }
 0xc04   : > { %v2224_v61 = vmul.f32 0.7978846, %v2220_v63  ;;  %v2211_v15 = vmul.f32 %v2207_v58, %v2185_v57  ;;  %v3079_v0 = vpop.eup %3078 }
 0xc05   : > { %v2230_v4 = vadd.f32 1.0, %v3079_v0 }
 0xc06   : > { %v2215_v62 = vmul.f32 %v2211_v15, %v2185_v57  ;;  %3080 = vtanh.f32 %v2224_v61 }
 0xc07   : > { %3082 = vtanh.f32 %v2221_v60  ;;  %v2234_v12 = vmul.f32 %v2230_v4, %v2202_v6 }
 0xc08   : > { %v2219_v2 = vadd.f32 %v2215_v62, %v2185_v57 }
 0xc0a   : > { %v2223_v3 = vmul.f32 0.7978846, %v2219_v2 }
 0xc0c   : > { %v3081_v11 = vpop.eup %3080  ;;  %3084 = vtanh.f32 %v2223_v3 }
 0xc0d   : > { %v2232_v8 = vadd.f32 1.0, %v3081_v11  ;;  %v3083_v10 = vpop.eup %3082 }
 0xc0e   : > { %v2229_v16 = vadd.f32 1.0, %v3083_v10 }
 0xc0f   : > { %v2236_v14 = vmul.f32 %v2232_v8, %v2204_v7 }
 0xc10   : > { %v2233_v59 = vmul.f32 %v2229_v16, %v2201_v18 }
 0xc11   : > { %v2238_v1 = vpack.c.bf16 %v2236_v14, %v2234_v12 }
 0xc12   : > { %v3085_v17 = vpop.eup %3084 }
 0xc13   : > { %2393 = vmatmul.bf16.vlgmr.msra.gmra.mxu2 %v2238_v1  ;;  %v2231_v20 = vadd.f32 1.0, %v3085_v17 }
 0xc15   : > { %v2235_v22 = vmul.f32 %v2231_v20, %v2203_v19 }
 0xc17   : > { %v2237_v23 = vpack.c.bf16 %v2235_v22, %v2233_v59 }
 0xc19   : > { %2379 = vmatmul.bf16.vlgmr.msra.gmra.mxu1 %v2237_v23 }
 0xc96   : > { %v2380_v25 = vpop.f32.mrf.mxu1  ;;  %v2394_v26 = vpop.f32.mrf.mxu2 }
 0xc97   : > { %v2381_v28 = vadd.f32 %v3035_v24, %v2380_v25 }
 0xc99   : > { %v2395_v29 = vadd.f32 %v2394_v26, %v2381_v28 }
 0xc9b   : > { %v2399_v30 = vadd.f32 %v2395_v29, %v3831_v27 }
 0xc9d   : > { %2401 = vst [vmem:[#allocation2] sm:$0xff] %v2399_v30 }
 0xc9e   : > { %v2382_v31 = vpop.f32.mrf.mxu1  ;;  %v2396_v21 = vpop.f32.mrf.mxu2 }
 0xc9f   : > { %v2383_v32 = vadd.f32 %v3035_v24, %v2382_v31 }
 0xca1   : > { %v2397_v33 = vadd.f32 %v2396_v21, %v2383_v32  ;;  %2406 = sbr.rel (%p2929_p5) target bundleno = 3638 (0xe36), region = 112 }
 0xca3   : > { %v2400_v34 = vadd.f32 %v2397_v33, %v3835_v53 }
 0xca5   : > { %2402 = vst [vmem:[#allocation2 + $0x8] sm:$0x3] %v2400_v34 }
 0xca6   : > { %v2408_v13 = vrot.slane %v2399_v30, 4  ;;  %vm2410_vm9 = vcmask 1040384   ;;  %v2459_v27 = vld [vmem:[%s4006_s19 + $0x78] sm:$0xff]  ;;  %v2458_v37 = vld [vmem:[%s4006_s19 + $0x70] sm:$0xff]  ;;  %v2457_v42 = vld [vmem:[%s4006_s19 + $0x68] sm:$0xff]  ;;  %vm2484_vm12 = vcmask 1024  }
 0xca7   : > { %2464 = vmatpush.msra.mxu0 %v2459_v27  ;;  %v2456_v43 = vld [vmem:[%s4006_s19 + $0x60] sm:$0xff]  ;;  %v2455_v44 = vld [vmem:[%s4006_s19 + $0x58] sm:$0xff]  ;;  %v2454_v45 = vld [vmem:[%s4006_s19 + $0x50] sm:$0xff] }
 0xca8   : > { %v2411_v35 = vsel %vm2410_vm9, %v2399_v30, %v2408_v13  ;;  %v2453_v46 = vld [vmem:[%s4006_s19 + $0x48] sm:$0xff]  ;;  %v2452_v47 = vld [vmem:[%s4006_s19 + $0x40] sm:$0xff]  ;;  %v2451_v48 = vld [vmem:[%s4006_s19 + $0x38] sm:$0xff] }
 0xca9   : > { %v2414_v36 = vsel %vm1082_vm3, %v2411_v35, 0.0  ;;  %2465 = vmatpush.msra.mxu0 %v2458_v37  ;;  %v2450_v49 = vld [vmem:[%s4006_s19 + $0x30] sm:$0xff]  ;;  %v2449_v50 = vld [vmem:[%s4006_s19 + $0x28] sm:$0xff]  ;;  %v2448_v51 = vld [vmem:[%s4006_s19 + $0x20] sm:$0xff] }
 0xcaa   : > { %2415 = vadd.xlane.f32.xlu0 %v2414_v36  ;;  %v2447_v5 = vld [vmem:[%s4006_s19 + $0x18] sm:$0xff]  ;;  %v2446_v52 = vld [vmem:[%s4006_s19 + $0x10] sm:$0xff]  ;;  %v2445_v54 = vld [vmem:[%s4006_s19 + $0x8] sm:$0xff] }
 0xcab   : > { %2466 = vmatpush.msra.mxu0 %v2457_v42  ;;  %v2444_v55 = vld [vmem:[%s4006_s19] sm:$0xff]  ;;  %v3088_v7 = vld [vmem:[#allocation3] ss:$0 sm:$0xff] }
 0xcac   : > { %v3086_v2 = vld [vmem:[%s4039_s1] ss:$0 sm:$0xff] }
 0xcad   : > { %2467 = vmatpush.msra.mxu0 %v2456_v43 }
 0xcaf   : > { %2468 = vmatpush.msra.mxu0 %v2455_v44 }
 0xcb1   : > { %2469 = vmatpush.msra.mxu0 %v2454_v45 }
 0xcb3   : > { %2470 = vmatpush.msra.mxu0 %v2453_v46 }
 0xcb5   : > { %2471 = vmatpush.msra.mxu0 %v2452_v47 }
 0xcb7   : > { %2472 = vmatpush.msra.mxu0 %v2451_v48 }
 0xcb9   : > { %2473 = vmatpush.msra.mxu0 %v2450_v49 }
 0xcbb   : > { %2474 = vmatpush.msra.mxu0 %v2449_v50 }
 0xcbd   : > { %2475 = vmatpush.msra.mxu0 %v2448_v51 }
 0xcbf   : > { %2476 = vmatpush.msra.mxu0 %v2447_v5 }
 0xcc1   : > { %2477 = vmatpush.msra.mxu0 %v2446_v52 }
 0xcc3   : > { %2478 = vmatpush.msra.mxu0 %v2445_v54 }
 0xcc5   : > { %2479 = vmatpush.msra.mxu0 %v2444_v55 }
 0xd1d   : > { %v2416_v53 = vpop.xlane.xlu0 %2415 }
 0xd1e   : > { %v2417_v38 = vmul.f32 %v2416_v53, %v3615_v9 }
 0xd20   : > { %v2418_v39 = vsub.f32 %v2411_v35, %v2417_v38 }
 0xd22   : > { %v2419_v40 = vmul.f32 %v2418_v39, %v2418_v39 }
 0xd24   : > { %v2420_v41 = vsel %vm1082_vm3, %v2419_v40, 0.0 }
 0xd25   : > { %2421 = vadd.xlane.f32.xlu0 %v2420_v41 }
 0xd98   : > { %v2422_v56 = vpop.xlane.xlu0 %2421 }
 0xd99   : > { %v2423_v57 = vmul.f32 %v2422_v56, %v3615_v9  ;;  %v3087_v9 = vld [vmem:[%s4040_s2] ss:$0 sm:$0xff] }
 0xd9b   : > { %v2424_v63 = vadd.f32 1e-06, %v2423_v57 }
 0xd9d   : > { %3089 = vrsqrt.f32 %v2424_v63  ;;  %vm2431_vm10 = vweird.f32 %v2424_v63 }
 0xda3   : > { %v3090_v58 = vpop.eup %3089 }
 0xda4   : > { %v2426_v60 = vmul.f32 %v3090_v58, %v2424_v63  ;;  %vm2432_vm3 = vweird.f32 %v3090_v58 }
 0xda5   : > { %vm2433_vm11 = vmor %vm2431_vm10, %vm2432_vm3 }
 0xda6   : > { %v2427_v61 = vmul.f32 %v3090_v58, %v2426_v60 }
 0xda8   : > { %v2428_v15 = vmul.f32 0.5, %v2427_v61 }
 0xdaa   : > { %v2429_v62 = vsub.f32 1.5, %v2428_v15 }
 0xdac   : > { %v2430_v0 = vmul.f32 %v3090_v58, %v2429_v62 }
 0xdae   : > { %v2434_v3 = vsel %vm2433_vm11, %v3090_v58, %v2430_v0 }
 0xdaf   : > { %v2435_v4 = vmul.f32 %v2434_v3, %v2418_v39 }
 0xdb1   : > { %v2439_v11 = vmul.f32 %v3086_v2, %v2435_v4 }
 0xdb3   : > { %v2443_v6 = vadd.f32 %v3087_v9, %v2439_v11 }
 0xdb5   : > { %2480 = vmatmul.f32.vlgmr.msra.gmra.mxu0 %v2443_v6 }
 0xe32   : > { %v2481_v8 = vpop.f32.mrf.mxu0 }
 0xe33   : > { %v2482_v10 = vadd.f32 %v3088_v7, %v2481_v8 }
 0xe35   : > { %2485 = vst.msk [vmem:[%s4041_s27] sm:$0x3] %vm2484_vm12, %v2482_v10 }
 0xe36 PF: > { %s4042_s5 = sld [smem:[#allocation4_spill]] }
 0xe3c   : > { %s33_s26 = sadd.s32 1, %s4042_s5  }
 0xe3d   : > { %p30_p6 = scmp.ge.s32.totalorder %s33_s26, 4  }
 0xe3f   :  { %32 = sbr.rel (!%p30_p6) target bundleno = 12 (0xc), region = 171 }

</bundles_post_ra>
